<compile_context>
chip_gen: v7x
topology: tpu7x:2x2x1
jax: 0.10.0
libtpu: 0.0.40
codegen_flags: <defaults>
</compile_context>

<pallas_src>
import jax
import jax.numpy as jnp
import numpy as np
from jax.experimental import pallas as pl
from jax.experimental.pallas import tpu as pltpu


FC1_DIMS = 1024
FC2_DIMS = 512
LANE = 128
K_TILE = 512  # fc1 reduction tile over in_features


def _round_up(x, m):
    return (x + m - 1) // m * m


def _cdiv(a, b):
    return (a + b - 1) // b


def mlp_kernel(x_ref, w1_ref, b1_ref, w2_ref, b2_ref, w3_ref, b3_ref, o_ref, acc_ref):
    k = pl.program_id(1)

    @pl.when(k == 0)
    def _():
        acc_ref[...] = jnp.zeros_like(acc_ref)

    # fc1: bf16 operands on the MXU, f32 accumulation across K tiles.
    acc_ref[...] += jnp.dot(x_ref[...], w1_ref[...], preferred_element_type=jnp.float32)

    @pl.when(k == pl.num_programs(1) - 1)
    def _():
        # bias + ReLU in f32 (v5e VPU has no bf16), fused with the bf16 downcast so only
        # the bf16 copy of h1/h2 is materialized before the next MXU op.
        h1 = jnp.maximum(acc_ref[...] + b1_ref[...], 0.0).astype(jnp.bfloat16)
        h2 = jnp.dot(h1, w2_ref[...], preferred_element_type=jnp.float32)
        h2 = jnp.maximum(h2 + b2_ref[...], 0.0).astype(jnp.bfloat16)
        out = jnp.dot(h2, w3_ref[...], preferred_element_type=jnp.float32)
        o_ref[...] = (out + b3_ref[...]).astype(o_ref.dtype)


def prepare_params(params, *, k_tile=K_TILE):
    """One-time parameter prep (call at init / after each optimizer step, NOT per forward).

    Casts weights to bf16, pads fc1's in_features to a lane-dense/K-tileable size, and pads
    fc3's output columns to a multiple of 128 so kernel stores are unmasked.
    params: dict with w1 (in,1024), b1 (1,1024), w2 (1024,512), b2 (1,512),
            w3 (512,numActions), b3 (1,numActions), all float32.
    """
    w1, b1 = params["w1"], params["b1"]
    w2, b2 = params["w2"], params["b2"]
    w3, b3 = params["w3"], params["b3"]

    in_features = w1.shape[0]
    num_actions = w3.shape[1]

    in_pad = _round_up(in_features, LANE)
    if in_pad > k_tile:
        in_pad = _round_up(in_pad, k_tile)
        tk = k_tile
    else:
        tk = in_pad
    n_pad = _round_up(num_actions, LANE)

    w1_p = jnp.pad(w1, ((0, in_pad - in_features), (0, 0))).astype(jnp.bfloat16)
    w2_p = w2.astype(jnp.bfloat16)
    w3_p = jnp.pad(w3, ((0, 0), (0, n_pad - num_actions))).astype(jnp.bfloat16)
    b1_p = b1.reshape(1, -1).astype(jnp.float32)
    b2_p = b2.reshape(1, -1).astype(jnp.float32)
    b3_p = jnp.pad(b3.reshape(1, -1), ((0, 0), (0, n_pad - num_actions))).astype(jnp.float32)

    return dict(
        w1=w1_p, b1=b1_p, w2=w2_p, b2=b2_p, w3=w3_p, b3=b3_p,
        in_features=in_features, in_pad=in_pad, tk=tk,
        num_actions=num_actions, n_pad=n_pad,
    )


def network_forward(x, prep, *, block_batch=256):
    """x: (batch, in_features) float32. prep: output of prepare_params().

    Returns (batch, numActions) float32, matching PyTorch forward semantics
    (up to bf16 quantization of the matmul operands).
    """
    batch, in_features = x.shape
    assert in_features == prep["in_features"]
    in_pad, tk = prep["in_pad"], prep["tk"]
    n_pad, num_actions = prep["n_pad"], prep["num_actions"]
    fc1_dims = prep["w2"].shape[0]
    fc2_dims = prep["w2"].shape[1]

    # Batch tile: make sure the "parallel" axis has >= 2 tiles once batch >= 32 so both
    # v7x TensorCores get work (and v5e/v6e get a pipeline to hide x/out DMA behind).
    if batch >= 32:
        tb = min(block_batch, _round_up(_cdiv(batch, 2), 16))
    else:
        tb = _round_up(max(batch, 1), 16)
    b_pad = _round_up(batch, tb)
    nb = b_pad // tb
    nk = in_pad // tk

    # Only the (small) activations are touched per call: bf16 cast + zero padding.
    x_bf = x.astype(jnp.bfloat16)
    if (b_pad, in_pad) != (batch, in_features):
        x_bf = jnp.pad(x_bf, ((0, b_pad - batch), (0, in_pad - in_features)))

    out = pl.pallas_call(
        mlp_kernel,
        out_shape=jax.ShapeDtypeStruct((b_pad, n_pad), jnp.float32),
        grid=(nb, nk),
        in_specs=[
            pl.BlockSpec((tb, tk), lambda i, k: (i, k)),            # x: batch x K tile
            pl.BlockSpec((tk, fc1_dims), lambda i, k: (k, 0)),      # w1: K-tiled
            pl.BlockSpec((1, fc1_dims), lambda i, k: (0, 0)),       # b1 (VMEM-resident)
            pl.BlockSpec((fc1_dims, fc2_dims), lambda i, k: (0, 0)),# w2 (VMEM-resident)
            pl.BlockSpec((1, fc2_dims), lambda i, k: (0, 0)),       # b2
            pl.BlockSpec((fc2_dims, n_pad), lambda i, k: (0, 0)),   # w3 (lane-dense)
            pl.BlockSpec((1, n_pad), lambda i, k: (0, 0)),          # b3
        ],
        out_specs=pl.BlockSpec((tb, n_pad), lambda i, k: (i, 0)),
        scratch_shapes=[pltpu.VMEM((tb, fc1_dims), jnp.float32)],   # fc1 accumulator
        compiler_params=pltpu.CompilerParams(
            dimension_semantics=("parallel", "arbitrary"),
            vmem_limit_bytes=32 << 20,  # bounded tiles fit easily; safe on v7x (64 MiB phys)
        ),
    )(x_bf, prep["w1"], prep["b1"], prep["w2"], prep["b2"], prep["w3"], prep["b3"])

    return out[:batch, :num_actions]


def init_linear(key, fan_in, fan_out):
    """PyTorch nn.Linear default init: U(-1/sqrt(fan_in), 1/sqrt(fan_in))."""
    kw, kb = jax.random.split(key)
    bound = 1.0 / np.sqrt(fan_in)
    # stored as (in_features, out_features) so the kernel computes x @ W
    w = jax.random.uniform(kw, (fan_in, fan_out), jnp.float32, -bound, bound)
    b = jax.random.uniform(kb, (1, fan_out), jnp.float32, -bound, bound)
    return w, b


if __name__ == "__main__":
    # Small shapes consistent with the module: inputShape=(8,), numActions=4, batch=4.
    in_features = 8
    num_actions = 4
    batch = 4

    key = jax.random.PRNGKey(0)
    kx, k1, k2, k3 = jax.random.split(key, 4)

    w1, b1 = init_linear(k1, in_features, FC1_DIMS)
    w2, b2 = init_linear(k2, FC1_DIMS, FC2_DIMS)
    w3, b3 = init_linear(k3, FC2_DIMS, num_actions)
    params = dict(w1=w1, b1=b1, w2=w2, b2=b2, w3=w3, b3=b3)

    # One-time weight prep (hoisted out of the forward path).
    prep = prepare_params(params)

    x = jax.random.normal(kx, (batch, in_features), jnp.float32)

    out = network_forward(x, prep)
    out = jax.block_until_ready(out)

    # Reference that follows the same bf16-operand / f32-accumulate path as the kernel.
    x_bf = x.astype(jnp.bfloat16)
    w1_bf = w1.astype(jnp.bfloat16)
    w2_bf = w2.astype(jnp.bfloat16)
    w3_bf = w3.astype(jnp.bfloat16)
    h1 = jnp.maximum(jnp.dot(x_bf, w1_bf, preferred_element_type=jnp.float32) + b1, 0.0)
    h2 = jnp.maximum(jnp.dot(h1.astype(jnp.bfloat16), w2_bf, preferred_element_type=jnp.float32) + b2, 0.0)
    ref = jnp.dot(h2.astype(jnp.bfloat16), w3_bf, preferred_element_type=jnp.float32) + b3

    np.testing.assert_allclose(np.asarray(out), np.asarray(ref), rtol=1e-2, atol=1e-2)

    print("KERNEL_OK")
</pallas_src>

<mosaic_0001>
module attributes {stable_mosaic.version = 11 : i64} {
  func.func @mlp_kernel(%arg0: i32, %arg1: i32, %arg2: memref<16x128xbf16, #tpu.memory_space<vmem>>, %arg3: memref<128x1024xbf16, #tpu.memory_space<vmem>>, %arg4: memref<1x1024xf32, #tpu.memory_space<vmem>>, %arg5: memref<1024x512xbf16, #tpu.memory_space<vmem>>, %arg6: memref<1x512xf32, #tpu.memory_space<vmem>>, %arg7: memref<512x128xbf16, #tpu.memory_space<vmem>>, %arg8: memref<1x128xf32, #tpu.memory_space<vmem>>, %arg9: memref<16x128xf32, #tpu.memory_space<vmem>>, %arg10: memref<16x1024xf32, #tpu.memory_space<vmem>>) attributes {dimension_semantics = [#tpu.dimension_semantics<parallel>, #tpu.dimension_semantics<arbitrary>], iteration_bounds = array<i64: 1, 1>, scalar_prefetch = 0 : i64, scratch_operands = 1 : i64, tpu.core_type = #tpu.core_type<tc>, window_params = [{transform_indices = @transform_0, window_bounds = array<i64: 16, 128>}, {transform_indices = @transform_1, window_bounds = array<i64: 128, 1024>}, {pipeline_mode = #tpu.pipeline_mode<synchronous>, transform_indices = @transform_2, window_bounds = array<i64: 1, 1024>}, {pipeline_mode = #tpu.pipeline_mode<synchronous>, transform_indices = @transform_3, window_bounds = array<i64: 1024, 512>}, {pipeline_mode = #tpu.pipeline_mode<synchronous>, transform_indices = @transform_4, window_bounds = array<i64: 1, 512>}, {pipeline_mode = #tpu.pipeline_mode<synchronous>, transform_indices = @transform_5, window_bounds = array<i64: 512, 128>}, {pipeline_mode = #tpu.pipeline_mode<synchronous>, transform_indices = @transform_6, window_bounds = array<i64: 1, 128>}, {transform_indices = @transform_7, window_bounds = array<i64: 16, 128>}]} {
    %c0_i32 = arith.constant 0 : i32
    %0 = arith.cmpi eq, %arg1, %c0_i32 : i32
    %1 = arith.extui %0 : i1 to i32
    %c0_i32_0 = arith.constant 0 : i32
    %2 = arith.cmpi ne, %1, %c0_i32_0 : i32
    scf.if %2 {
      %cst_10 = arith.constant 0.000000e+00 : f32
      %12 = vector.broadcast %cst_10 : f32 to vector<16x1024xf32>
      %c0_11 = arith.constant 0 : index
      %c0_12 = arith.constant 0 : index
      %13 = vector.load %arg10[%c0_11, %c0_12] : memref<16x1024xf32, #tpu.memory_space<vmem>>, vector<16x1024xf32>
      tpu.vector_store %arg10[%c0_11, %c0_12], %12 {strides = array<i32>} : memref<16x1024xf32, #tpu.memory_space<vmem>>, vector<16x1024xf32>,
    } else {
    }
    %c0 = arith.constant 0 : index
    %c0_1 = arith.constant 0 : index
    %3 = vector.load %arg10[%c0, %c0_1] : memref<16x1024xf32, #tpu.memory_space<vmem>>, vector<16x1024xf32>
    %c0_2 = arith.constant 0 : index
    %c0_3 = arith.constant 0 : index
    %4 = vector.load %arg2[%c0_2, %c0_3] : memref<16x128xbf16, #tpu.memory_space<vmem>>, vector<16x128xbf16>
    %c0_4 = arith.constant 0 : index
    %c0_5 = arith.constant 0 : index
    %5 = vector.load %arg3[%c0_4, %c0_5] : memref<128x1024xbf16, #tpu.memory_space<vmem>>, vector<128x1024xbf16>
    %cst = arith.constant dense<0.000000e+00> : vector<16x1024xf32>
    %6 = tpu.matmul %4, %5, %cst {dimension_numbers = #tpu.dot_dimension_numbers<[1], [0], [0], [1], [0, 0, 1, 1], [], []>} : vector<16x128xbf16>, vector<128x1024xbf16>, vector<16x1024xf32> -> vector<16x1024xf32>
    %7 = arith.addf %3, %6 : vector<16x1024xf32>
    %c0_6 = arith.constant 0 : index
    %c0_7 = arith.constant 0 : index
    %8 = vector.load %arg10[%c0_6, %c0_7] : memref<16x1024xf32, #tpu.memory_space<vmem>>, vector<16x1024xf32>
    tpu.vector_store %arg10[%c0_6, %c0_7], %7 {strides = array<i32>} : memref<16x1024xf32, #tpu.memory_space<vmem>>, vector<16x1024xf32>,
    %c0_i32_8 = arith.constant 0 : i32
    %9 = arith.cmpi eq, %arg1, %c0_i32_8 : i32
    %10 = arith.extui %9 : i1 to i32
    %c0_i32_9 = arith.constant 0 : i32
    %11 = arith.cmpi ne, %10, %c0_i32_9 : i32
    scf.if %11 {
      %c0_10 = arith.constant 0 : index
      %c0_11 = arith.constant 0 : index
      %12 = vector.load %arg10[%c0_10, %c0_11] : memref<16x1024xf32, #tpu.memory_space<vmem>>, vector<16x1024xf32>
      %c0_12 = arith.constant 0 : index
      %c0_13 = arith.constant 0 : index
      %13 = vector.load %arg4[%c0_12, %c0_13] : memref<1x1024xf32, #tpu.memory_space<vmem>>, vector<1x1024xf32>
      %14 = vector.broadcast %13 : vector<1x1024xf32> to vector<16x1024xf32>
      %15 = arith.addf %12, %14 : vector<16x1024xf32>
      %cst_14 = arith.constant 0.000000e+00 : f32
      %16 = vector.broadcast %cst_14 : f32 to vector<16x1024xf32>
      %17 = arith.maximumf %15, %16 : vector<16x1024xf32>
      %18 = arith.truncf %17 : vector<16x1024xf32> to vector<16x1024xbf16>
      %c0_15 = arith.constant 0 : index
      %c0_16 = arith.constant 0 : index
      %19 = vector.load %arg5[%c0_15, %c0_16] : memref<1024x512xbf16, #tpu.memory_space<vmem>>, vector<1024x512xbf16>
      %cst_17 = arith.constant dense<0.000000e+00> : vector<16x512xf32>
      %20 = tpu.matmul %18, %19, %cst_17 {dimension_numbers = #tpu.dot_dimension_numbers<[1], [0], [0], [1], [0, 0, 1, 1], [], []>} : vector<16x1024xbf16>, vector<1024x512xbf16>, vector<16x512xf32> -> vector<16x512xf32>
      %c0_18 = arith.constant 0 : index
      %c0_19 = arith.constant 0 : index
      %21 = vector.load %arg6[%c0_18, %c0_19] : memref<1x512xf32, #tpu.memory_space<vmem>>, vector<1x512xf32>
      %22 = vector.broadcast %21 : vector<1x512xf32> to vector<16x512xf32>
      %23 = arith.addf %20, %22 : vector<16x512xf32>
      %cst_20 = arith.constant 0.000000e+00 : f32
      %24 = vector.broadcast %cst_20 : f32 to vector<16x512xf32>
      %25 = arith.maximumf %23, %24 : vector<16x512xf32>
      %26 = arith.truncf %25 : vector<16x512xf32> to vector<16x512xbf16>
      %c0_21 = arith.constant 0 : index
      %c0_22 = arith.constant 0 : index
      %27 = vector.load %arg7[%c0_21, %c0_22] : memref<512x128xbf16, #tpu.memory_space<vmem>>, vector<512x128xbf16>
      %cst_23 = arith.constant dense<0.000000e+00> : vector<16x128xf32>
      %28 = tpu.matmul %26, %27, %cst_23 {dimension_numbers = #tpu.dot_dimension_numbers<[1], [0], [0], [1], [0, 0, 1, 1], [], []>} : vector<16x512xbf16>, vector<512x128xbf16>, vector<16x128xf32> -> vector<16x128xf32>
      %c0_24 = arith.constant 0 : index
      %c0_25 = arith.constant 0 : index
      %29 = vector.load %arg8[%c0_24, %c0_25] : memref<1x128xf32, #tpu.memory_space<vmem>>, vector<1x128xf32>
      %30 = vector.broadcast %29 : vector<1x128xf32> to vector<16x128xf32>
      %31 = arith.addf %28, %30 : vector<16x128xf32>
      %c0_26 = arith.constant 0 : index
      %c0_27 = arith.constant 0 : index
      %32 = vector.load %arg9[%c0_26, %c0_27] : memref<16x128xf32, #tpu.memory_space<vmem>>, vector<16x128xf32>
      tpu.vector_store %arg9[%c0_26, %c0_27], %31 {strides = array<i32>} : memref<16x128xf32, #tpu.memory_space<vmem>>, vector<16x128xf32>,
    } else {
    }
    return
  }
  func.func @transform_0(%arg0: i32, %arg1: i32) -> (i32, i32) {
    %c0_i32 = arith.constant 0 : i32
    return %arg0, %arg1 : i32, i32
  }
  func.func @transform_1(%arg0: i32, %arg1: i32) -> (i32, i32) {
    %c0_i32 = arith.constant 0 : i32
    %c0_i32_0 = arith.constant 0 : i32
    return %arg1, %c0_i32 : i32, i32
  }
  func.func @transform_2(%arg0: i32, %arg1: i32) -> (i32, i32) {
    %c0_i32 = arith.constant 0 : i32
    %c0_i32_0 = arith.constant 0 : i32
    %c0_i32_1 = arith.constant 0 : i32
    return %c0_i32, %c0_i32_0 : i32, i32
  }
  func.func @transform_3(%arg0: i32, %arg1: i32) -> (i32, i32) {
    %c0_i32 = arith.constant 0 : i32
    %c0_i32_0 = arith.constant 0 : i32
    %c0_i32_1 = arith.constant 0 : i32
    return %c0_i32, %c0_i32_0 : i32, i32
  }
  func.func @transform_4(%arg0: i32, %arg1: i32) -> (i32, i32) {
    %c0_i32 = arith.constant 0 : i32
    %c0_i32_0 = arith.constant 0 : i32
    %c0_i32_1 = arith.constant 0 : i32
    return %c0_i32, %c0_i32_0 : i32, i32
  }
  func.func @transform_5(%arg0: i32, %arg1: i32) -> (i32, i32) {
    %c0_i32 = arith.constant 0 : i32
    %c0_i32_0 = arith.constant 0 : i32
    %c0_i32_1 = arith.constant 0 : i32
    return %c0_i32, %c0_i32_0 : i32, i32
  }
  func.func @transform_6(%arg0: i32, %arg1: i32) -> (i32, i32) {
    %c0_i32 = arith.constant 0 : i32
    %c0_i32_0 = arith.constant 0 : i32
    %c0_i32_1 = arith.constant 0 : i32
    return %c0_i32, %c0_i32_0 : i32, i32
  }
  func.func @transform_7(%arg0: i32, %arg1: i32) -> (i32, i32) {
    %c0_i32 = arith.constant 0 : i32
    %c0_i32_0 = arith.constant 0 : i32
    return %arg0, %c0_i32 : i32, i32
  }
}

</mosaic_0001>

<bundles_post_ra>
// kernel: tpu_custom_call.1
= control target key start
LH: loop header
LB: loop body
LE: loop exit
PB: predicated region body
PF: predicated region fallthrough
CT: control target
= control target key end

     0   :  { %12 = vsyncpa [#allocation4], 0  ;;  %s4314_s0 = inlined_call_operand.hbm [shape: bf16[16,128], index: 0, kind: input, shape index: {}]   ;;  %s4315_s1 = inlined_call_operand.hbm [shape: bf16[128,1024], index: 1, kind: input, shape index: {}]   ;;  %s4316_s2 = inlined_call_operand.hbm [shape: f32[1,1024], index: 2, kind: input, shape index: {}]   ;;  %s4317_s3 = inlined_call_operand.hbm [shape: bf16[1024,512], index: 3, kind: input, shape index: {}]   ;;  %s4318_s4 = inlined_call_operand.vmem [shape: f32[1,512], index: 4, kind: input, shape index: {}]   ;;  %s4319_s5 = inlined_call_operand.hbm [shape: bf16[512,128], index: 5, kind: input, shape index: {}]   ;;  %s4320_s6 = inlined_call_operand.vmem [shape: f32[1,128], index: 6, kind: input, shape index: {}]   ;;  %s4321_s7 = inlined_call_operand.hbm [shape: f32[16,128], index: 7, kind: output, shape index: {}]  }
   0x1   :  { %13 = vsyncpa [#allocation7], 0 }
   0x2   :  { %14 = vsyncpa [#allocation10], 0 }
   0x3   :  { %15 = vsyncpa [#allocation5], 0  ;;  %s4109_s24 = smov [#allocation6]   ;;  %s3969_s28 = scalar_lea.hbm %s4315_s1, 8192 }
   0x4   :  { %s33_s25 = sshll.u32 %s4109_s24, 4  ;;  %p3970_p0 = scmp.ne.s32.totalorder %s4315_s1, %s3969_s28  ;;  %s34_s25 = int_to_ptr.vmem [resolvable:$true] %s33_s25 }
   0x5   :  { %p3973_p1 = scmp.lt.u32.totalorder %s3969_s28, %s4315_s1 }
   0x7   :  { %p3975_p2 = pnand %p3973_p1, %p3970_p0 }
   0x9   :  { %3978 = shalt.err (!%p3975_p2)
}
   0xa   :  { %s3979_s10 = scalar_lea.vmem %s34_s25, 8192  ;;  %p3984_p4 = scmp.lt.s32.totalorder %s34_s25, %s34_s25 }
   0xb   :  { %p3980_p3 = scmp.ne.s32.totalorder %s34_s25, %s3979_s10  ;;  %p3985_p5 = scmp.lt.s32.totalorder %s3979_s10, %s3979_s10 }
   0xd   :  { %p3986_p6 = por %p3985_p5, %p3984_p4 }
   0xf   :  { %p3987_p7 = pnand %p3986_p6, %p3980_p3 }
  0x11   :  { %3990 = shalt.err (!%p3987_p7)
}
  0x12   :  { %s4110_s11 = smov 512   ;;  %s4111_s12 = smov 32  }
  0x13   :  { %39 = dma.hbm_to_vmem [thread:$0]  %s4315_s1, 8192, %s34_s25, [#allocation7], %s4110_s11, %s4110_s11, %s4111_s12  }
  0x14   :  { %s4112_s15 = smov [#allocation9]   ;;  %s3991_s19 = scalar_lea.hbm %s4317_s3, 32768 }
  0x15   :  { %s55_s16 = sshll.u32 %s4112_s15, 4  ;;  %p3992_p8 = scmp.ne.s32.totalorder %s4317_s3, %s3991_s19  ;;  %s56_s16 = int_to_ptr.vmem [resolvable:$true] %s55_s16 }
  0x16   :  { %p3995_p9 = scmp.lt.u32.totalorder %s3991_s19, %s4317_s3 }
  0x18   :  { %p3997_p10 = pnand %p3995_p9, %p3992_p8 }
  0x1a   :  { %4000 = shalt.err (!%p3997_p10)
}
  0x1b   :  { %s4001_s24 = scalar_lea.vmem %s56_s16, 32768  ;;  %p4006_p12 = scmp.lt.s32.totalorder %s56_s16, %s56_s16 }
  0x1c   :  { %p4002_p11 = scmp.ne.s32.totalorder %s56_s16, %s4001_s24  ;;  %p4007_p13 = scmp.lt.s32.totalorder %s4001_s24, %s4001_s24 }
  0x1e   :  { %p4008_p0 = por %p4007_p13, %p4006_p12 }
  0x20   :  { %p4009_p1 = pnand %p4008_p0, %p4002_p11 }
  0x22   :  { %4012 = shalt.err (!%p4009_p1)
}
  0x23   :  { %s4113_s1 = smov 256   ;;  %s4114_s25 = smov 16  }
  0x24   :  { %61 = dma.hbm_to_vmem [thread:$0]  %s4317_s3, 32768, %s56_s16, [#allocation10], %s4113_s1, %s4113_s1, %s4114_s25  }
  0x25   :  { %s4115_s28 = smov [#allocation3]   ;;  %s4013_s9 = scalar_lea.hbm %s4314_s0, 128 }
  0x26   :  { %s21_s29 = sshll.u32 %s4115_s28, 4  ;;  %p4014_p2 = scmp.ne.s32.totalorder %s4314_s0, %s4013_s9  ;;  %s22_s29 = int_to_ptr.vmem [resolvable:$true] %s21_s29 }
  0x27   :  { %p4017_p3 = scmp.lt.u32.totalorder %s4013_s9, %s4314_s0 }
  0x29   :  { %p4019_p4 = pnand %p4017_p3, %p4014_p2 }
  0x2b   :  { %4022 = shalt.err (!%p4019_p4)
}
  0x2c   :  { %s4023_s14 = scalar_lea.vmem %s22_s29, 128  ;;  %p4028_p6 = scmp.lt.s32.totalorder %s22_s29, %s22_s29 }
  0x2d   :  { %p4024_p5 = scmp.ne.s32.totalorder %s22_s29, %s4023_s14  ;;  %p4029_p7 = scmp.lt.s32.totalorder %s4023_s14, %s4023_s14 }
  0x2f   :  { %p4030_p8 = por %p4029_p7, %p4028_p6 }
  0x31   :  { %p4031_p9 = pnand %p4030_p8, %p4024_p5 }
  0x33   :  { %4034 = shalt.err (!%p4031_p9)
}
  0x34   :  { %s4116_s3 = smov 64   ;;  %s4117_s15 = smov 4  }
  0x35   :  { %27 = dma.hbm_to_vmem [thread:$0]  %s4314_s0, 128, %s22_s29, [#allocation4], %s4116_s3, %s4116_s3, %s4117_s15  }
  0x36   :  { %s4118_s18 = smov [#allocation8]   ;;  %s4119_s20 = smov [#allocation11]  }
  0x37   :  { %s46_s19 = sshll.u32 %s4118_s18, 4  ;;  %s69_s21 = sshll.u32 %s4119_s20, 4  ;;  %s47_s19 = int_to_ptr.vmem [resolvable:$true] %s46_s19  ;;  %s70_s21 = int_to_ptr.vmem [resolvable:$true] %s69_s21 }
  0x38   :  { %s4035_s24 = scalar_lea.hbm %s4316_s2, 128 }
  0x39   :  { %p4036_p10 = scmp.ne.s32.totalorder %s4316_s2, %s4035_s24  ;;  %p4039_p11 = scmp.lt.u32.totalorder %s4035_s24, %s4316_s2 }
  0x3b   :  { %p4041_p12 = pnand %p4039_p11, %p4036_p10 }
  0x3d   :  { %4044 = shalt.err (!%p4041_p12)
}
  0x3e   :  { %s4045_s0 = scalar_lea.vmem %s47_s19, 128  ;;  %p4050_p0 = scmp.lt.s32.totalorder %s47_s19, %s47_s19 }
  0x3f   :  { %p4046_p13 = scmp.ne.s32.totalorder %s47_s19, %s4045_s0  ;;  %p4051_p1 = scmp.lt.s32.totalorder %s4045_s0, %s4045_s0 }
  0x41   :  { %p4052_p2 = por %p4051_p1, %p4050_p0 }
  0x43   :  { %p4053_p3 = pnand %p4052_p2, %p4046_p13 }
  0x45   :  { %4056 = shalt.err (!%p4053_p3)
}
  0x46   :  { %49 = dma.hbm_to_vmem [thread:$0]  %s4316_s2, 128, %s47_s19, [#allocation7]  }
  0x47   :  { %s4057_s9 = scalar_lea.hbm %s4319_s5, 4096 }
  0x48   :  { %p4058_p4 = scmp.ne.s32.totalorder %s4319_s5, %s4057_s9  ;;  %p4061_p5 = scmp.lt.u32.totalorder %s4057_s9, %s4319_s5 }
  0x4a   :  { %p4063_p6 = pnand %p4061_p5, %p4058_p4 }
  0x4c   :  { %4066 = shalt.err (!%p4063_p6)
}
  0x4d   :  { %s4067_s14 = scalar_lea.vmem %s70_s21, 4096  ;;  %p4072_p8 = scmp.lt.s32.totalorder %s70_s21, %s70_s21 }
  0x4e   :  { %p4068_p7 = scmp.ne.s32.totalorder %s70_s21, %s4067_s14  ;;  %p4073_p9 = scmp.lt.s32.totalorder %s4067_s14, %s4067_s14 }
  0x50   :  { %p4074_p10 = por %p4073_p9, %p4072_p8 }
  0x52   :  { %p4075_p11 = pnand %p4074_p10, %p4068_p7 }
  0x54   :  { %4078 = shalt.err (!%p4075_p11)
}
  0x55   :  { %75 = dma.hbm_to_vmem [thread:$0]  %s4319_s5, 4096, %s70_s21, [#allocation10], %s4116_s3, %s4116_s3, %s4117_s15  }
  0x56   :  { %4101 = dma.done.wait [#allocation4], 128  }
  0x57   :  { %4102 = vsyncadd [#allocation4], 4294967168 }
  0x58   :  { %4103 = dma.done.wait [#allocation7], 8320  }
  0x59   :  { %4104 = vsyncadd [#allocation7], 4294958976 }
  0x5a   :  { %4105 = dma.done.wait [#allocation10], 36864  }
  0x5b   :  { %4106 = vsyncadd [#allocation10], 4294930432  ;;  %v4120_v0 = vmov 0   ;;  %v132_v1 = vld [vmem:[#allocation6] sm:$0xff]  ;;  %v133_v14 = vld [vmem:[#allocation6 + $0x8] sm:$0xff]  ;;  %s4121_s17 = smov [#allocation12]  }
  0x5c   :  { %554 = vmatprep.mubr.bf16.mxu0 %v4120_v0  ;;  %597 = vmatprep.mubr.bf16.mxu1 %v4120_v0  ;;  %v136_v2 = vld [vmem:[#allocation6 + $0x20] sm:$0xff]  ;;  %v137_v15 = vld [vmem:[#allocation6 + $0x28] sm:$0xff]  ;;  %v134_v57 = vld [vmem:[#allocation6 + $0x10] sm:$0xff]  ;;  %s3093_s18 = sshll.u32 %s4121_s17, 4  ;;  %s3094_s18 = int_to_ptr.vmem [resolvable:$true] %s3093_s18 }
  0x5d   :  { %v140_v3 = vld [vmem:[#allocation6 + $0x40] sm:$0xff]  ;;  %v3109_v4 = vcombine.high %v132_v1, %v136_v2  ;;  %v3108_v5 = vcombine.low %v132_v1, %v136_v2  ;;  %v3111_v16 = vcombine.high %v133_v14, %v137_v15  ;;  %v3110_v17 = vcombine.low %v133_v14, %v137_v15  ;;  %v141_v18 = vld [vmem:[#allocation6 + $0x48] sm:$0xff]  ;;  %v138_v59 = vld [vmem:[#allocation6 + $0x30] sm:$0xff]  ;;  %p4084_p13 = scmp.lt.s32.totalorder %s3094_s18, %s3094_s18 }
  0x5e   :  { %v144_v6 = vld [vmem:[#allocation6 + $0x60] sm:$0xff]  ;;  %v145_v19 = vld [vmem:[#allocation6 + $0x68] sm:$0xff]  ;;  %v3113_v1 = vcombine.high %v134_v57, %v138_v59  ;;  %v142_v2 = vld [vmem:[#allocation6 + $0x50] sm:$0xff] }
  0x5f   :  { %v3117_v7 = vcombine.high %v140_v3, %v144_v6  ;;  %v148_v8 = vld [vmem:[#allocation6 + $0x80] sm:$0xff]  ;;  %522 = vmatprep.subr.bf16.mxu0 %v3109_v4  ;;  %v3116_v10 = vcombine.low %v140_v3, %v144_v6  ;;  %v3119_v21 = vcombine.high %v141_v18, %v145_v19  ;;  %v149_v22 = vld [vmem:[#allocation6 + $0x88] sm:$0xff]  ;;  %565 = vmatprep.subr.bf16.mxu1 %v3111_v16  ;;  %v146_v4 = vld [vmem:[#allocation6 + $0x70] sm:$0xff] }
  0x60   :  { %v152_v9 = vld [vmem:[#allocation6 + $0xa0] sm:$0xff]  ;;  %523 = vmatpush1.bf16.msra.mxu0 %v3108_v5  ;;  %v153_v23 = vld [vmem:[#allocation6 + $0xa8] sm:$0xff]  ;;  %566 = vmatpush1.bf16.msra.mxu1 %v3110_v17  ;;  %v3118_v27 = vcombine.low %v141_v18, %v145_v19  ;;  %v4232_v5 = vld [vmem:[#allocation3] sm:$0xff]   ;;  %v3120_v15 = vcombine.low %v142_v2, %v146_v4 }
  0x61   :  { %524 = vmatprep.subr.bf16.mxu0 %v3117_v7  ;;  %v3125_v11 = vcombine.high %v148_v8, %v152_v9  ;;  %v156_v12 = vld [vmem:[#allocation6 + $0xc0] sm:$0xff]  ;;  %v3124_v20 = vcombine.low %v148_v8, %v152_v9  ;;  %567 = vmatprep.subr.bf16.mxu1 %v3119_v21  ;;  %v3127_v28 = vcombine.high %v149_v22, %v153_v23  ;;  %v157_v30 = vld [vmem:[#allocation6 + $0xc8] sm:$0xff]  ;;  %v135_v8 = vld [vmem:[#allocation6 + $0x18] sm:$0xff] }
  0x62   :  { %v160_v13 = vld [vmem:[#allocation6 + $0xe0] sm:$0xff]  ;;  %v161_v31 = vld [vmem:[#allocation6 + $0xe8] sm:$0xff]  ;;  %v3126_v35 = vcombine.low %v149_v22, %v153_v23  ;;  %v3112_v7 = vcombine.low %v134_v57, %v138_v59  ;;  %v139_v9 = vld [vmem:[#allocation6 + $0x38] sm:$0xff] }
  0x63   :  { %v3133_v24 = vcombine.high %v156_v12, %v160_v13  ;;  %v164_v25 = vld [vmem:[#allocation6 + $0x100] sm:$0xff]  ;;  %v3132_v29 = vcombine.low %v156_v12, %v160_v13  ;;  %v3135_v36 = vcombine.high %v157_v30, %v161_v31  ;;  %v165_v38 = vld [vmem:[#allocation6 + $0x108] sm:$0xff]  ;;  %v3134_v43 = vcombine.low %v157_v30, %v161_v31  ;;  %v154_v13 = vld [vmem:[#allocation6 + $0xb0] sm:$0xff] }
  0x64   :  { %525 = vmatpush1.bf16.msra.mxu0 %v3116_v10  ;;  %v168_v26 = vld [vmem:[#allocation6 + $0x120] sm:$0xff]  ;;  %568 = vmatpush1.bf16.msra.mxu1 %v3118_v27  ;;  %v169_v39 = vld [vmem:[#allocation6 + $0x128] sm:$0xff]  ;;  %v3121_v10 = vcombine.high %v142_v2, %v146_v4  ;;  %v3115_v14 = vcombine.high %v135_v8, %v139_v9  ;;  %v143_v16 = vld [vmem:[#allocation6 + $0x58] sm:$0xff]  ;;  %v3114_v21 = vcombine.low %v135_v8, %v139_v9 }
  0x65   :  { %526 = vmatprep.subr.bf16.mxu0 %v3125_v11  ;;  %v3141_v32 = vcombine.high %v164_v25, %v168_v26  ;;  %v172_v33 = vld [vmem:[#allocation6 + $0x140] sm:$0xff]  ;;  %569 = vmatprep.subr.bf16.mxu1 %v3127_v28  ;;  %v3140_v37 = vcombine.low %v164_v25, %v168_v26  ;;  %v3143_v44 = vcombine.high %v165_v38, %v169_v39  ;;  %v173_v46 = vld [vmem:[#allocation6 + $0x148] sm:$0xff]  ;;  %v150_v11 = vld [vmem:[#allocation6 + $0x90] sm:$0xff] }
  0x66   :  { %v176_v34 = vld [vmem:[#allocation6 + $0x160] sm:$0xff]  ;;  %v177_v47 = vld [vmem:[#allocation6 + $0x168] sm:$0xff]  ;;  %v3142_v51 = vcombine.low %v165_v38, %v169_v39  ;;  %v147_v17 = vld [vmem:[#allocation6 + $0x78] sm:$0xff]  ;;  %v3129_v18 = vcombine.high %v150_v11, %v154_v13  ;;  %v3128_v23 = vcombine.low %v150_v11, %v154_v13 }
  0x67   :  { %v3149_v40 = vcombine.high %v172_v33, %v176_v34  ;;  %v180_v41 = vld [vmem:[#allocation6 + $0x180] sm:$0xff]  ;;  %v3148_v45 = vcombine.low %v172_v33, %v176_v34  ;;  %v3151_v52 = vcombine.high %v173_v46, %v177_v47  ;;  %v181_v54 = vld [vmem:[#allocation6 + $0x188] sm:$0xff]  ;;  %v3150_v58 = vcombine.low %v173_v46, %v177_v47  ;;  %v158_v19 = vld [vmem:[#allocation6 + $0xd0] sm:$0xff] }
  0x68   :  { %527 = vmatpush1.bf16.msra.mxu0 %v3124_v20  ;;  %v184_v42 = vld [vmem:[#allocation6 + $0x1a0] sm:$0xff]  ;;  %570 = vmatpush1.bf16.msra.mxu1 %v3126_v35  ;;  %v185_v55 = vld [vmem:[#allocation6 + $0x1a8] sm:$0xff]  ;;  %v162_v20 = vld [vmem:[#allocation6 + $0xf0] sm:$0xff]  ;;  %v3123_v22 = vcombine.high %v143_v16, %v147_v17 }
  0x69   :  { %528 = vmatprep.subr.bf16.mxu0 %v3133_v24  ;;  %571 = vmatprep.subr.bf16.mxu1 %v3135_v36  ;;  %v3157_v48 = vcombine.high %v180_v41, %v184_v42  ;;  %v188_v49 = vld [vmem:[#allocation6 + $0x1c0] sm:$0xff]  ;;  %v3156_v53 = vcombine.low %v180_v41, %v184_v42  ;;  %v3159_v60 = vcombine.high %v181_v54, %v185_v55  ;;  %v189_v62 = vld [vmem:[#allocation6 + $0x1c8] sm:$0xff]  ;;  %v151_v24 = vld [vmem:[#allocation6 + $0x98] sm:$0xff] }
  0x6a   :  { %v192_v50 = vld [vmem:[#allocation6 + $0x1e0] sm:$0xff]  ;;  %v193_v63 = vld [vmem:[#allocation6 + $0x1e8] sm:$0xff]  ;;  %v3158_v3 = vcombine.low %v181_v54, %v185_v55  ;;  %v155_v25 = vld [vmem:[#allocation6 + $0xb8] sm:$0xff]  ;;  %v3137_v26 = vcombine.high %v158_v19, %v162_v20  ;;  %v3136_v31 = vcombine.low %v158_v19, %v162_v20 }
  0x6b   :  { %v3165_v56 = vcombine.high %v188_v49, %v192_v50  ;;  %v3164_v61 = vcombine.low %v188_v49, %v192_v50  ;;  %v3167_v6 = vcombine.high %v189_v62, %v193_v63  ;;  %v3166_v12 = vcombine.low %v189_v62, %v193_v63  ;;  %v166_v27 = vld [vmem:[#allocation6 + $0x110] sm:$0xff]  ;;  %v163_v33 = vld [vmem:[#allocation6 + $0xf8] sm:$0xff] }
  0x6c   :  { %529 = vmatpush1.bf16.msra.mxu0 %v3132_v29  ;;  %572 = vmatpush1.bf16.msra.mxu1 %v3134_v43  ;;  %v170_v28 = vld [vmem:[#allocation6 + $0x130] sm:$0xff]  ;;  %v3122_v29 = vcombine.low %v143_v16, %v147_v17  ;;  %v3131_v30 = vcombine.high %v151_v24, %v155_v25  ;;  %v171_v41 = vld [vmem:[#allocation6 + $0x138] sm:$0xff] }
  0x6d   :  { %530 = vmatprep.subr.bf16.mxu0 %v3141_v32  ;;  %573 = vmatprep.subr.bf16.mxu1 %v3143_v44  ;;  %v159_v32 = vld [vmem:[#allocation6 + $0xd8] sm:$0xff]  ;;  %v3145_v34 = vcombine.high %v166_v27, %v170_v28  ;;  %v174_v35 = vld [vmem:[#allocation6 + $0x150] sm:$0xff]  ;;  %v3144_v39 = vcombine.low %v166_v27, %v170_v28 }
  0x6e   :  { %v178_v36 = vld [vmem:[#allocation6 + $0x170] sm:$0xff]  ;;  %v3139_v38 = vcombine.high %v159_v32, %v163_v33  ;;  %v3138_v44 = vcombine.low %v159_v32, %v163_v33  ;;  %v175_v47 = vld [vmem:[#allocation6 + $0x158] sm:$0xff] }
  0x6f   :  { %v182_v42 = vld [vmem:[#allocation6 + $0x190] sm:$0xff]  ;;  %v3152_v46 = vcombine.low %v174_v35, %v178_v36  ;;  %v183_v55 = vld [vmem:[#allocation6 + $0x198] sm:$0xff] }
  0x70   :  { %531 = vmatpush1.bf16.msra.mxu0 %v3140_v37  ;;  %574 = vmatpush1.bf16.msra.mxu1 %v3142_v51  ;;  %v3130_v37 = vcombine.low %v151_v24, %v155_v25  ;;  %v186_v43 = vld [vmem:[#allocation6 + $0x1b0] sm:$0xff]  ;;  %v191_v59 = vld [vmem:[#allocation6 + $0x1d8] sm:$0xff] }
  0x71   :  { %532 = vmatprep.subr.bf16.mxu0 %v3149_v40  ;;  %575 = vmatprep.subr.bf16.mxu1 %v3151_v52  ;;  %v167_v40 = vld [vmem:[#allocation6 + $0x118] sm:$0xff]  ;;  %v3161_v49 = vcombine.high %v182_v42, %v186_v43  ;;  %v190_v50 = vld [vmem:[#allocation6 + $0x1d0] sm:$0xff]  ;;  %v3160_v54 = vcombine.low %v182_v42, %v186_v43 }
  0x72   :  { %v194_v51 = vld [vmem:[#allocation6 + $0x1f0] sm:$0xff]  ;;  %v3146_v52 = vcombine.low %v167_v40, %v171_v41  ;;  %v3555_v62 = vld [vmem:[#allocation9 + $0x4] ss:$16 sps:$4 sm:$0xff]   ;;  %v3553_v2 = vld [vmem:[#allocation9] ss:$16 sps:$4 sm:$0xff]  }
  0x73   :  { %v3169_v57 = vcombine.high %v190_v50, %v194_v51  ;;  %v3168_v63 = vcombine.low %v190_v50, %v194_v51  ;;  %v3561_v4 = vld [vmem:[#allocation9 + $0x24] ss:$16 sps:$4 sm:$0xff]   ;;  %v3559_v8 = vld [vmem:[#allocation9 + $0x20] ss:$16 sps:$4 sm:$0xff]   ;;  %v3564_v11 = vld [vmem:[#allocation9 + $0x2c] ss:$16 sps:$4 sm:$0xff]  }
  0x74   :  { %533 = vmatpush1.bf16.msra.mxu0 %v3148_v45  ;;  %576 = vmatpush1.bf16.msra.mxu1 %v3150_v58  ;;  %v3147_v45 = vcombine.high %v167_v40, %v171_v41  ;;  %v3567_v9 = vld [vmem:[#allocation9 + $0x44] ss:$16 sps:$4 sm:$0xff]   ;;  %v3571_v16 = vld [vmem:[#allocation9 + $0x60] ss:$16 sps:$4 sm:$0xff]   ;;  %v3576_v19 = vld [vmem:[#allocation9 + $0x6c] ss:$16 sps:$4 sm:$0xff]  }
  0x75   :  { %534 = vmatprep.subr.bf16.mxu0 %v3157_v48  ;;  %577 = vmatprep.subr.bf16.mxu1 %v3159_v60  ;;  %v179_v48 = vld [vmem:[#allocation6 + $0x178] sm:$0xff]  ;;  %v3580_v25 = vld [vmem:[#allocation9 + $0x88] ss:$16 sps:$4 sm:$0xff]  }
  0x76   :  { %v3154_v58 = vcombine.low %v175_v47, %v179_v48  ;;  %v3573_v13 = vld [vmem:[#allocation9 + $0x64] ss:$16 sps:$4 sm:$0xff]   ;;  %v3577_v20 = vld [vmem:[#allocation9 + $0x80] ss:$16 sps:$4 sm:$0xff]   ;;  %v3592_v33 = vld [vmem:[#allocation9 + $0xc8] ss:$16 sps:$4 sm:$0xff]  }
  0x77   :  { %v3579_v17 = vld [vmem:[#allocation9 + $0x84] ss:$16 sps:$4 sm:$0xff]   ;;  %v3589_v27 = vld [vmem:[#allocation9 + $0xc0] ss:$16 sps:$4 sm:$0xff]   ;;  %v3604_v41 = vld [vmem:[#allocation9 + $0x108] ss:$16 sps:$4 sm:$0xff]  }
  0x78   :  { %535 = vmatpush1.bf16.msra.mxu0 %v3156_v53  ;;  %578 = vmatpush1.bf16.msra.mxu1 %v3158_v3  ;;  %v3155_v53 = vcombine.high %v175_v47, %v179_v48  ;;  %v3591_v24 = vld [vmem:[#allocation9 + $0xc4] ss:$16 sps:$4 sm:$0xff]   ;;  %v3613_v42 = vld [vmem:[#allocation9 + $0x140] ss:$16 sps:$4 sm:$0xff]   ;;  %v3616_v48 = vld [vmem:[#allocation9 + $0x148] ss:$16 sps:$4 sm:$0xff]  }
  0x79   :  { %536 = vmatprep.subr.bf16.mxu0 %v3165_v56  ;;  %579 = vmatprep.subr.bf16.mxu1 %v3167_v6  ;;  %v187_v56 = vld [vmem:[#allocation6 + $0x1b8] sm:$0xff]  ;;  %v3558_v6 = vld [vmem:[#allocation9 + $0xc] ss:$16 sps:$4 sm:$0xff]  }
  0x7a   :  { %v3163_v60 = vcombine.high %v183_v55, %v187_v56  ;;  %v3597_v28 = vld [vmem:[#allocation9 + $0xe4] ss:$16 sps:$4 sm:$0xff]   ;;  %v3625_v50 = vld [vmem:[#allocation9 + $0x180] ss:$16 sps:$4 sm:$0xff]  }
  0x7b   :  { %v3603_v32 = vld [vmem:[#allocation9 + $0x104] ss:$16 sps:$4 sm:$0xff]  }
  0x7c   :  { %537 = vmatpush1.bf16.msra.mxu0 %v3164_v61  ;;  %580 = vmatpush1.bf16.msra.mxu1 %v3166_v12  ;;  %v195_v61 = vld [vmem:[#allocation6 + $0x1f8] sm:$0xff] }
  0x7d   :  { %608 = vmatprep.subr.bf16.mxu0 %v3113_v1  ;;  %651 = vmatprep.subr.bf16.mxu1 %v3115_v14  ;;  %v3162_v1 = vcombine.low %v183_v55, %v187_v56  ;;  %v3171_v3 = vcombine.high %v191_v59, %v195_v61  ;;  %v3565_v12 = vld [vmem:[#allocation9 + $0x40] ss:$16 sps:$4 sm:$0xff]   ;;  %v3562_v14 = vld [vmem:[#allocation9 + $0x28] ss:$16 sps:$4 sm:$0xff]   ;;  %v3615_v40 = vld [vmem:[#allocation9 + $0x144] ss:$16 sps:$4 sm:$0xff]  }
  0x7e   :  { %v3621_v43 = vld [vmem:[#allocation9 + $0x164] ss:$16 sps:$4 sm:$0xff]   ;;  %v3628_v55 = vld [vmem:[#allocation9 + $0x188] ss:$16 sps:$4 sm:$0xff]  }
  0x7f   :  { %555 = vmatmul.mubr.bf16.vlgmr.msra.gmra.mrb[0].mxu0 %v4232_v5  ;;  %598 = vmatmul.mubr.bf16.vlgmr.msra.gmra.mrb[0].mxu1 %v4232_v5  ;;  %v3627_v47 = vld [vmem:[#allocation9 + $0x184] ss:$16 sps:$4 sm:$0xff]  }
  0x80   :  { %609 = vmatpush1.bf16.msra.mxu0 %v3112_v7  ;;  %640 = vmatprep.mubr.bf16.mxu0 %v4120_v0  ;;  %v3170_v7 = vcombine.low %v191_v59, %v195_v61  ;;  %v3633_v51 = vld [vmem:[#allocation9 + $0x1a4] ss:$16 sps:$4 sm:$0xff]   ;;  %v3634_v59 = vld [vmem:[#allocation9 + $0x1a8] ss:$16 sps:$4 sm:$0xff]   ;;  %v3642_v61 = vld [vmem:[#allocation9 + $0x1cc] ss:$16 sps:$4 sm:$0xff]  }
  0x81   :  { %610 = vmatprep.subr.bf16.mxu0 %v3121_v10  ;;  %652 = vmatpush1.bf16.msra.mxu1 %v3114_v21  ;;  %v3556_v10 = vld [vmem:[#allocation9 + $0x8] ss:$16 sps:$4 sm:$0xff]   ;;  %v3585_v21 = vld [vmem:[#allocation9 + $0xa4] ss:$16 sps:$4 sm:$0xff]  }
  0x82   :  { %683 = vmatprep.mubr.bf16.mxu1 %v4120_v0  ;;  %653 = vmatprep.subr.bf16.mxu1 %v3123_v22  ;;  %v3153_v0 = vcombine.high %v174_v35, %v178_v36  ;;  %v3574_v22 = vld [vmem:[#allocation9 + $0x68] ss:$16 sps:$4 sm:$0xff]   ;;  %v3601_v35 = vld [vmem:[#allocation9 + $0x100] ss:$16 sps:$4 sm:$0xff]   ;;  %v3609_v36 = vld [vmem:[#allocation9 + $0x124] ss:$16 sps:$4 sm:$0xff]  }
  0x83   :  { %v3639_v56 = vld [vmem:[#allocation9 + $0x1c4] ss:$16 sps:$4 sm:$0xff]  }
  0x84   :  { %611 = vmatpush1.bf16.msra.mxu0 %v3120_v15  ;;  %v3570_v15 = vld [vmem:[#allocation9 + $0x4c] ss:$16 sps:$4 sm:$0xff]  }
  0x85   :  { %612 = vmatprep.subr.bf16.mxu0 %v3129_v18  ;;  %654 = vmatpush1.bf16.msra.mxu1 %v3122_v29  ;;  %v3568_v18 = vld [vmem:[#allocation9 + $0x48] ss:$16 sps:$4 sm:$0xff]  }
  0x86   :  { %655 = vmatprep.subr.bf16.mxu1 %v3131_v30  ;;  %v3586_v29 = vld [vmem:[#allocation9 + $0xa8] ss:$16 sps:$4 sm:$0xff]   ;;  %v3594_v30 = vld [vmem:[#allocation9 + $0xcc] ss:$16 sps:$4 sm:$0xff]  }
  0x88   :  { %613 = vmatpush1.bf16.msra.mxu0 %v3128_v23  ;;  %v3582_v23 = vld [vmem:[#allocation9 + $0x8c] ss:$16 sps:$4 sm:$0xff]  }
  0x89   :  { %614 = vmatprep.subr.bf16.mxu0 %v3137_v26  ;;  %656 = vmatpush1.bf16.msra.mxu1 %v3130_v37  ;;  %v3588_v26 = vld [vmem:[#allocation9 + $0xac] ss:$16 sps:$4 sm:$0xff]   ;;  %v3598_v37 = vld [vmem:[#allocation9 + $0xe8] ss:$16 sps:$4 sm:$0xff]  }
  0x8a   :  { %657 = vmatprep.subr.bf16.mxu1 %v3139_v38  ;;  %v3606_v38 = vld [vmem:[#allocation9 + $0x10c] ss:$16 sps:$4 sm:$0xff]  }
  0x8c   :  { %615 = vmatpush1.bf16.msra.mxu0 %v3136_v31  ;;  %v3595_v31 = vld [vmem:[#allocation9 + $0xe0] ss:$16 sps:$4 sm:$0xff]  }
  0x8d   :  { %616 = vmatprep.subr.bf16.mxu0 %v3145_v34  ;;  %658 = vmatpush1.bf16.msra.mxu1 %v3138_v44  ;;  %v3600_v34 = vld [vmem:[#allocation9 + $0xec] ss:$16 sps:$4 sm:$0xff]   ;;  %v3610_v44 = vld [vmem:[#allocation9 + $0x128] ss:$16 sps:$4 sm:$0xff]  }
  0x8e   :  { %659 = vmatprep.subr.bf16.mxu1 %v3147_v45  ;;  %v3618_v45 = vld [vmem:[#allocation9 + $0x14c] ss:$16 sps:$4 sm:$0xff]  }
  0x90   :  { %617 = vmatpush1.bf16.msra.mxu0 %v3144_v39  ;;  %v3607_v39 = vld [vmem:[#allocation9 + $0x120] ss:$16 sps:$4 sm:$0xff]  }
  0x91   :  { %618 = vmatprep.subr.bf16.mxu0 %v3153_v0  ;;  %660 = vmatpush1.bf16.msra.mxu1 %v3146_v52  ;;  %v3612_v0 = vld [vmem:[#allocation9 + $0x12c] ss:$16 sps:$4 sm:$0xff]   ;;  %v3622_v52 = vld [vmem:[#allocation9 + $0x168] ss:$16 sps:$4 sm:$0xff]  }
  0x92   :  { %661 = vmatprep.subr.bf16.mxu1 %v3155_v53  ;;  %v3630_v53 = vld [vmem:[#allocation9 + $0x18c] ss:$16 sps:$4 sm:$0xff]  }
  0x94   :  { %619 = vmatpush1.bf16.msra.mxu0 %v3152_v46  ;;  %v3619_v46 = vld [vmem:[#allocation9 + $0x160] ss:$16 sps:$4 sm:$0xff]  }
  0x95   :  { %620 = vmatprep.subr.bf16.mxu0 %v3161_v49  ;;  %662 = vmatpush1.bf16.msra.mxu1 %v3154_v58  ;;  %v3624_v49 = vld [vmem:[#allocation9 + $0x16c] ss:$16 sps:$4 sm:$0xff]   ;;  %v3637_v58 = vld [vmem:[#allocation9 + $0x1c0] ss:$16 sps:$4 sm:$0xff]  }
  0x96   :  { %663 = vmatprep.subr.bf16.mxu1 %v3163_v60  ;;  %v3645_v60 = vld [vmem:[#allocation9 + $0x1e4] ss:$16 sps:$4 sm:$0xff]  }
  0x98   :  { %621 = vmatpush1.bf16.msra.mxu0 %v3160_v54  ;;  %v3631_v54 = vld [vmem:[#allocation9 + $0x1a0] ss:$16 sps:$4 sm:$0xff]  }
  0x99   :  { %622 = vmatprep.subr.bf16.mxu0 %v3169_v57  ;;  %664 = vmatpush1.bf16.msra.mxu1 %v3162_v1  ;;  %v3636_v57 = vld [vmem:[#allocation9 + $0x1ac] ss:$16 sps:$4 sm:$0xff]   ;;  %v3651_v1 = vld [vmem:[#allocation9 + $0x204] ss:$16 sps:$4 sm:$0xff]  }
  0x9a   :  { %665 = vmatprep.subr.bf16.mxu1 %v3171_v3  ;;  %v3646_v3 = vld [vmem:[#allocation9 + $0x1e8] ss:$16 sps:$4 sm:$0xff]  }
  0x9c   :  { %623 = vmatpush1.bf16.msra.mxu0 %v3168_v63  ;;  %v3640_v63 = vld [vmem:[#allocation9 + $0x1c8] ss:$16 sps:$4 sm:$0xff]  }
  0x9d   :  { %2385 = vmatprep.subr.bf16.mxu0 %v3555_v62  ;;  %666 = vmatpush1.bf16.msra.mxu1 %v3170_v7  ;;  %v3643_v62 = vld [vmem:[#allocation9 + $0x1e0] ss:$16 sps:$4 sm:$0xff]  }
  0x9e   :  { %2557 = vmatprep.subr.bf16.mxu1 %v3558_v6  ;;  %v747_v6 = vlaneseq }
  0x9f   :  { %641 = vmatmul.mubr.bf16.vlgmr.msra.gmra.mrb[4].mxu0 %v4232_v5 }
  0xa0   :  { %2386 = vmatpush1.bf16.msra.mxu0 %v3553_v2  ;;  %684 = vmatmul.mubr.bf16.vlgmr.msra.gmra.mrb[4].mxu1 %v4232_v5  ;;  %v3583_v5 = vld [vmem:[#allocation9 + $0xa0] ss:$16 sps:$4 sm:$0xff]   ;;  %v3648_v2 = vld [vmem:[#allocation9 + $0x1ec] ss:$16 sps:$4 sm:$0xff]   ;;  %v4240_v7 = vshrl.u32 %v747_v6, 7 }
  0xa1   :  { %2387 = vmatprep.subr.bf16.mxu0 %v3561_v4  ;;  %2558 = vmatpush1.bf16.msra.mxu1 %v3556_v10  ;;  %v3654_v4 = vld [vmem:[#allocation9 + $0x20c] ss:$16 sps:$4 sm:$0xff]  }
  0xa2   :  { %2559 = vmatprep.subr.bf16.mxu1 %v3564_v11  ;;  %v753_v10 = vsub.s32 1, %v4240_v7  ;;  %v3690_v6 = vld [vmem:[#allocation9 + $0x2cc] ss:$16 sps:$4 sm:$0xff]  }
  0xa4   :  { %2388 = vmatpush1.bf16.msra.mxu0 %v3559_v8  ;;  %v749_v8 = vsub.s32 0, %v4240_v7 }
  0xa5   :  { %2389 = vmatprep.subr.bf16.mxu0 %v3567_v9  ;;  %2560 = vmatpush1.bf16.msra.mxu1 %v3562_v14  ;;  %v4243_v9 = vld [vmem:[#allocation8] sm:$0xff] }
  0xa6   :  { %2561 = vmatprep.subr.bf16.mxu1 %v3570_v15  ;;  %v750_v11 = vrot.slane %v4243_v9, %v749_v8  ;;  %v761_v15 = vsub.s32 3, %v4240_v7 }
  0xa8   :  { %2390 = vmatpush1.bf16.msra.mxu0 %v3565_v12  ;;  %v754_v12 = vrot.slane %v4243_v9, %v753_v10 }
  0xa9   :  { %2391 = vmatprep.subr.bf16.mxu0 %v3573_v13  ;;  %2562 = vmatpush1.bf16.msra.mxu1 %v3568_v18  ;;  %v757_v13 = vsub.s32 2, %v4240_v7 }
  0xaa   :  { %2563 = vmatprep.subr.bf16.mxu1 %v3576_v19 }
  0xac   :  { %2392 = vmatpush1.bf16.msra.mxu0 %v3571_v16 }
  0xad   :  { %2393 = vmatprep.subr.bf16.mxu0 %v3579_v17  ;;  %2564 = vmatpush1.bf16.msra.mxu1 %v3574_v22  ;;  %v758_v22 = vrot.slane %v4243_v9, %v757_v13 }
  0xae   :  { %2565 = vmatprep.subr.bf16.mxu1 %v3582_v23 }
  0xb0   :  { %2394 = vmatpush1.bf16.msra.mxu0 %v3577_v20 }
  0xb1   :  { %2395 = vmatprep.subr.bf16.mxu0 %v3585_v21  ;;  %2566 = vmatpush1.bf16.msra.mxu1 %v3580_v25 }
  0xb2   :  { %2567 = vmatprep.subr.bf16.mxu1 %v3588_v26 }
  0xb4   :  { %2396 = vmatpush1.bf16.msra.mxu0 %v3583_v5  ;;  %v762_v5 = vrot.slane %v4243_v9, %v761_v15 }
  0xb5   :  { %2397 = vmatprep.subr.bf16.mxu0 %v3591_v24  ;;  %2568 = vmatpush1.bf16.msra.mxu1 %v3586_v29 }
  0xb6   :  { %2569 = vmatprep.subr.bf16.mxu1 %v3594_v30 }
  0xb8   :  { %2398 = vmatpush1.bf16.msra.mxu0 %v3589_v27 }
  0xb9   :  { %2399 = vmatprep.subr.bf16.mxu0 %v3597_v28  ;;  %2570 = vmatpush1.bf16.msra.mxu1 %v3592_v33  ;;  %v3649_v33 = vld [vmem:[#allocation9 + $0x200] ss:$16 sps:$4 sm:$0xff]  }
  0xba   :  { %2571 = vmatprep.subr.bf16.mxu1 %v3600_v34  ;;  %v3652_v34 = vld [vmem:[#allocation9 + $0x208] ss:$16 sps:$4 sm:$0xff]  }
  0xbc   :  { %2400 = vmatpush1.bf16.msra.mxu0 %v3595_v31 }
  0xbd   :  { %2401 = vmatprep.subr.bf16.mxu0 %v3603_v32  ;;  %2572 = vmatpush1.bf16.msra.mxu1 %v3598_v37  ;;  %v3657_v37 = vld [vmem:[#allocation9 + $0x224] ss:$16 sps:$4 sm:$0xff]  }
  0xbe   :  { %2573 = vmatprep.subr.bf16.mxu1 %v3606_v38  ;;  %v3660_v38 = vld [vmem:[#allocation9 + $0x22c] ss:$16 sps:$4 sm:$0xff]  }
  0xc0   :  { %2402 = vmatpush1.bf16.msra.mxu0 %v3601_v35 }
  0xc1   :  { %2403 = vmatprep.subr.bf16.mxu0 %v3609_v36  ;;  %2574 = vmatpush1.bf16.msra.mxu1 %v3604_v41 }
  0xc2   :  { %2575 = vmatprep.subr.bf16.mxu1 %v3612_v0 }
  0xc4   :  { %2404 = vmatpush1.bf16.msra.mxu0 %v3607_v39 }
  0xc5   :  { %2405 = vmatprep.subr.bf16.mxu0 %v3615_v40  ;;  %2576 = vmatpush1.bf16.msra.mxu1 %v3610_v44  ;;  %v3655_v44 = vld [vmem:[#allocation9 + $0x220] ss:$16 sps:$4 sm:$0xff]  }
  0xc6   :  { %2577 = vmatprep.subr.bf16.mxu1 %v3618_v45  ;;  %v3658_v45 = vld [vmem:[#allocation9 + $0x228] ss:$16 sps:$4 sm:$0xff]  }
  0xc8   :  { %2406 = vmatpush1.bf16.msra.mxu0 %v3613_v42 }
  0xc9   :  { %2407 = vmatprep.subr.bf16.mxu0 %v3621_v43  ;;  %2578 = vmatpush1.bf16.msra.mxu1 %v3616_v48  ;;  %v3666_v48 = vld [vmem:[#allocation9 + $0x24c] ss:$16 sps:$4 sm:$0xff]  }
  0xca   :  { %2579 = vmatprep.subr.bf16.mxu1 %v3624_v49 }
  0xcc   :  { %2408 = vmatpush1.bf16.msra.mxu0 %v3619_v46 }
  0xcd   :  { %2409 = vmatprep.subr.bf16.mxu0 %v3627_v47  ;;  %2580 = vmatpush1.bf16.msra.mxu1 %v3622_v52  ;;  %v3663_v47 = vld [vmem:[#allocation9 + $0x244] ss:$16 sps:$4 sm:$0xff]   ;;  %v3664_v52 = vld [vmem:[#allocation9 + $0x248] ss:$16 sps:$4 sm:$0xff]  }
  0xce   :  { %2581 = vmatprep.subr.bf16.mxu1 %v3630_v53  ;;  %v3669_v53 = vld [vmem:[#allocation9 + $0x264] ss:$16 sps:$4 sm:$0xff]  }
  0xd0   :  { %2410 = vmatpush1.bf16.msra.mxu0 %v3625_v50 }
  0xd1   :  { %2411 = vmatprep.subr.bf16.mxu0 %v3633_v51  ;;  %2582 = vmatpush1.bf16.msra.mxu1 %v3628_v55  ;;  %v3661_v51 = vld [vmem:[#allocation9 + $0x240] ss:$16 sps:$4 sm:$0xff]  }
  0xd2   :  { %2583 = vmatprep.subr.bf16.mxu1 %v3636_v57  ;;  %v3667_v55 = vld [vmem:[#allocation9 + $0x260] ss:$16 sps:$4 sm:$0xff]   ;;  %v3675_v57 = vld [vmem:[#allocation9 + $0x284] ss:$16 sps:$4 sm:$0xff]  }
  0xd4   :  { %2412 = vmatpush1.bf16.msra.mxu0 %v3631_v54  ;;  %v3672_v54 = vld [vmem:[#allocation9 + $0x26c] ss:$16 sps:$4 sm:$0xff]  }
  0xd5   :  { %2413 = vmatprep.subr.bf16.mxu0 %v3639_v56  ;;  %2584 = vmatpush1.bf16.msra.mxu1 %v3634_v59  ;;  %v3670_v56 = vld [vmem:[#allocation9 + $0x268] ss:$16 sps:$4 sm:$0xff]   ;;  %v3673_v59 = vld [vmem:[#allocation9 + $0x280] ss:$16 sps:$4 sm:$0xff]  }
  0xd6   :  { %2585 = vmatprep.subr.bf16.mxu1 %v3642_v61  ;;  %v3681_v61 = vld [vmem:[#allocation9 + $0x2a4] ss:$16 sps:$4 sm:$0xff]  }
  0xd8   :  { %2414 = vmatpush1.bf16.msra.mxu0 %v3637_v58  ;;  %v3678_v58 = vld [vmem:[#allocation9 + $0x28c] ss:$16 sps:$4 sm:$0xff]  }
  0xd9   :  { %2415 = vmatprep.subr.bf16.mxu0 %v3645_v60  ;;  %2586 = vmatpush1.bf16.msra.mxu1 %v3640_v63  ;;  %v3676_v60 = vld [vmem:[#allocation9 + $0x288] ss:$16 sps:$4 sm:$0xff]   ;;  %v765_v63 = vsub.s32 4, %v4240_v7 }
  0xda   :  { %2587 = vmatprep.subr.bf16.mxu1 %v3648_v2  ;;  %v3679_v2 = vld [vmem:[#allocation9 + $0x2a0] ss:$16 sps:$4 sm:$0xff]  }
  0xdc   :  { %2416 = vmatpush1.bf16.msra.mxu0 %v3643_v62  ;;  %v3684_v62 = vld [vmem:[#allocation9 + $0x2ac] ss:$16 sps:$4 sm:$0xff]  }
  0xdd   :  { %2428 = vmatprep.subr.bf16.mxu0 %v3651_v1  ;;  %2588 = vmatpush1.bf16.msra.mxu1 %v3646_v3  ;;  %v769_v1 = vsub.s32 5, %v4240_v7  ;;  %v3682_v3 = vld [vmem:[#allocation9 + $0x2a8] ss:$16 sps:$4 sm:$0xff]  }
  0xde   :  { %2600 = vmatprep.subr.bf16.mxu1 %v3654_v4  ;;  %v3687_v4 = vld [vmem:[#allocation9 + $0x2c4] ss:$16 sps:$4 sm:$0xff]  }
 0x152   :  { %v556_v14 = vpop.f32.mrb[0].mxu0  ;;  %v599_v28 = vpop.f32.mrb[0].mxu1 }
 0x153   :  { %v787_v16 = vadd.f32 %v750_v11, %v556_v14  ;;  %v558_v17 = vpop.f32.mrb[1].mxu0  ;;  %v789_v30 = vadd.f32 %v758_v22, %v599_v28  ;;  %v601_v31 = vpop.f32.mrb[1].mxu1  ;;  %v773_v14 = vsub.s32 6, %v4240_v7 }
 0x154   :  { %v788_v18 = vadd.f32 %v754_v12, %v558_v17  ;;  %v560_v19 = vpop.f32.mrb[2].mxu0  ;;  %v790_v35 = vadd.f32 %v762_v5, %v601_v31  ;;  %v603_v36 = vpop.f32.mrb[2].mxu1  ;;  %v3688_v17 = vld [vmem:[#allocation9 + $0x2c8] ss:$16 sps:$4 sm:$0xff]  }
 0x155   :  { %v795_v20 = vadd.f32 %v750_v11, %v560_v19  ;;  %v562_v21 = vpop.f32.mrb[3].mxu0  ;;  %v803_v24 = vmax.f32 %v787_v16, 0.0  ;;  %v805_v39 = vmax.f32 %v789_v30, 0.0  ;;  %v797_v40 = vadd.f32 %v758_v22, %v603_v36  ;;  %v605_v41 = vpop.f32.mrb[3].mxu1  ;;  %v3685_v16 = vld [vmem:[#allocation9 + $0x2c0] ss:$16 sps:$4 sm:$0xff]  }
 0x156   :  { %v796_v23 = vadd.f32 %v754_v12, %v562_v21  ;;  %v804_v26 = vmax.f32 %v788_v18, 0.0  ;;  %v806_v0 = vmax.f32 %v790_v35, 0.0  ;;  %v798_v42 = vadd.f32 %v762_v5, %v605_v41  ;;  %v3696_v21 = vld [vmem:[#allocation9 + $0x2ec] ss:$16 sps:$4 sm:$0xff]   ;;  %v3694_v30 = vld [vmem:[#allocation9 + $0x2e8] ss:$16 sps:$4 sm:$0xff]  }
 0x157   :  { %v811_v25 = vmax.f32 %v795_v20, 0.0  ;;  %v813_v43 = vmax.f32 %v797_v40, 0.0  ;;  %v766_v11 = vrot.slane %v4243_v9, %v765_v63  ;;  %v770_v12 = vrot.slane %v4243_v9, %v769_v1  ;;  %v3693_v20 = vld [vmem:[#allocation9 + $0x2e4] ss:$16 sps:$4 sm:$0xff]   ;;  %v3702_v35 = vld [vmem:[#allocation9 + $0x30c] ss:$16 sps:$4 sm:$0xff]  }
 0x158   :  { %v812_v27 = vmax.f32 %v796_v23, 0.0  ;;  %v814_v46 = vmax.f32 %v798_v42, 0.0  ;;  %v777_v19 = vsub.s32 7, %v4240_v7  ;;  %v774_v28 = vrot.slane %v4243_v9, %v773_v14  ;;  %v3700_v42 = vld [vmem:[#allocation9 + $0x308] ss:$16 sps:$4 sm:$0xff]  }
 0x159   :  { %v819_v29 = vpack.c.bf16 %v811_v25, %v803_v24  ;;  %v4260_v49 = vpack.c.bf16 %v813_v43, %v805_v39  ;;  %v3717_v63 = vld [vmem:[#allocation9 + $0x364] ss:$16 sps:$4 sm:$0xff]   ;;  %v3720_v1 = vld [vmem:[#allocation9 + $0x36c] ss:$16 sps:$4 sm:$0xff]  }
 0x15a   :  { %v820_v32 = vpack.c.bf16 %v812_v27, %v804_v26  ;;  %v822_v50 = vpack.c.bf16 %v814_v46, %v806_v0  ;;  %v3697_v0 = vld [vmem:[#allocation9 + $0x300] ss:$16 sps:$4 sm:$0xff]   ;;  %v3708_v46 = vld [vmem:[#allocation9 + $0x32c] ss:$16 sps:$4 sm:$0xff]   ;;  %v3729_v14 = vld [vmem:[#allocation9 + $0x3a4] ss:$16 sps:$4 sm:$0xff]  }
 0x15c   :  { %2417 = vmatprep.mubr.bf16.mxu0 %v820_v32  ;;  %2589 = vmatprep.mubr.bf16.mxu1 %v820_v32 }
 0x15d   :  { %2418 = vmatmul.mubr.bf16.vlgmr.msra.gmra.mrb[8].mxu0 %v819_v29  ;;  %2590 = vmatmul.mubr.bf16.vlgmr.msra.gmra.mrb[8].mxu1 %v819_v29  ;;  %v3691_v29 = vld [vmem:[#allocation9 + $0x2e0] ss:$16 sps:$4 sm:$0xff]  }
 0x15e   :  { %2429 = vmatpush1.bf16.msra.mxu0 %v3649_v33  ;;  %2601 = vmatpush1.bf16.msra.mxu1 %v3652_v34  ;;  %v778_v33 = vrot.slane %v4243_v9, %v777_v19  ;;  %v3699_v34 = vld [vmem:[#allocation9 + $0x304] ss:$16 sps:$4 sm:$0xff]  }
 0x15f   :  { %2430 = vmatprep.subr.bf16.mxu0 %v3657_v37  ;;  %2602 = vmatprep.subr.bf16.mxu1 %v3660_v38  ;;  %v3705_v9 = vld [vmem:[#allocation9 + $0x324] ss:$16 sps:$4 sm:$0xff]  }
 0x160   :  { %2460 = vmatprep.mubr.bf16.mxu0 %v822_v50  ;;  %2632 = vmatprep.mubr.bf16.mxu1 %v822_v50  ;;  %v3735_v19 = vld [vmem:[#allocation9 + $0x3c4] ss:$16 sps:$4 sm:$0xff]  }
 0x162   :  { %2431 = vmatpush1.bf16.msra.mxu0 %v3655_v44  ;;  %2603 = vmatpush1.bf16.msra.mxu1 %v3658_v45 }
 0x163   :  { %2432 = vmatprep.subr.bf16.mxu0 %v3663_v47  ;;  %2604 = vmatprep.subr.bf16.mxu1 %v3666_v48 }
 0x166   :  { %2433 = vmatpush1.bf16.msra.mxu0 %v3661_v51  ;;  %2605 = vmatpush1.bf16.msra.mxu1 %v3664_v52 }
 0x167   :  { %2434 = vmatprep.subr.bf16.mxu0 %v3669_v53  ;;  %2606 = vmatprep.subr.bf16.mxu1 %v3672_v54  ;;  %v3703_v54 = vld [vmem:[#allocation9 + $0x320] ss:$16 sps:$4 sm:$0xff]  }
 0x16a   :  { %2435 = vmatpush1.bf16.msra.mxu0 %v3667_v55  ;;  %2607 = vmatpush1.bf16.msra.mxu1 %v3670_v56  ;;  %v3706_v55 = vld [vmem:[#allocation9 + $0x328] ss:$16 sps:$4 sm:$0xff]  }
 0x16b   :  { %2436 = vmatprep.subr.bf16.mxu0 %v3675_v57  ;;  %2608 = vmatprep.subr.bf16.mxu1 %v3678_v58  ;;  %v3711_v57 = vld [vmem:[#allocation9 + $0x344] ss:$16 sps:$4 sm:$0xff]   ;;  %v3714_v58 = vld [vmem:[#allocation9 + $0x34c] ss:$16 sps:$4 sm:$0xff]  }
 0x16e   :  { %2437 = vmatpush1.bf16.msra.mxu0 %v3673_v59  ;;  %2609 = vmatpush1.bf16.msra.mxu1 %v3676_v60 }
 0x16f   :  { %2438 = vmatprep.subr.bf16.mxu0 %v3681_v61  ;;  %2610 = vmatprep.subr.bf16.mxu1 %v3684_v62  ;;  %v3709_v61 = vld [vmem:[#allocation9 + $0x340] ss:$16 sps:$4 sm:$0xff]   ;;  %v3712_v62 = vld [vmem:[#allocation9 + $0x348] ss:$16 sps:$4 sm:$0xff]  }
 0x172   :  { %2439 = vmatpush1.bf16.msra.mxu0 %v3679_v2  ;;  %2611 = vmatpush1.bf16.msra.mxu1 %v3682_v3  ;;  %v642_v18 = vpop.f32.mrb[4].mxu0  ;;  %v3715_v2 = vld [vmem:[#allocation9 + $0x360] ss:$16 sps:$4 sm:$0xff]   ;;  %v3718_v3 = vld [vmem:[#allocation9 + $0x368] ss:$16 sps:$4 sm:$0xff]  }
 0x173   :  { %2440 = vmatprep.subr.bf16.mxu0 %v3687_v4  ;;  %2612 = vmatprep.subr.bf16.mxu1 %v3690_v6  ;;  %v791_v22 = vadd.f32 %v766_v11, %v642_v18  ;;  %v644_v23 = vpop.f32.mrb[5].mxu0  ;;  %v685_v38 = vpop.f32.mrb[4].mxu1  ;;  %v3723_v4 = vld [vmem:[#allocation9 + $0x384] ss:$16 sps:$4 sm:$0xff]   ;;  %v3726_v6 = vld [vmem:[#allocation9 + $0x38c] ss:$16 sps:$4 sm:$0xff]  }
 0x174   :  { %v792_v5 = vadd.f32 %v770_v12, %v644_v23  ;;  %v646_v24 = vpop.f32.mrb[6].mxu0  ;;  %v793_v40 = vadd.f32 %v774_v28, %v685_v38  ;;  %v687_v41 = vpop.f32.mrb[5].mxu1  ;;  %v3730_v18 = vld [vmem:[#allocation9 + $0x3a8] ss:$16 sps:$4 sm:$0xff]   ;;  %v3741_v23 = vld [vmem:[#allocation9 + $0x3e4] ss:$16 sps:$4 sm:$0xff]  }
 0x175   :  { %v807_v25 = vmax.f32 %v791_v22, 0.0  ;;  %v799_v26 = vadd.f32 %v766_v11, %v646_v24  ;;  %v648_v27 = vpop.f32.mrb[7].mxu0  ;;  %v794_v44 = vadd.f32 %v778_v33, %v687_v41  ;;  %v689_v45 = vpop.f32.mrb[6].mxu1  ;;  %v3721_v11 = vld [vmem:[#allocation9 + $0x380] ss:$16 sps:$4 sm:$0xff]  }
 0x176   :  { %2441 = vmatpush1.bf16.msra.mxu0 %v3685_v16  ;;  %2613 = vmatpush1.bf16.msra.mxu1 %v3688_v17  ;;  %v808_v31 = vmax.f32 %v792_v5, 0.0  ;;  %v800_v32 = vadd.f32 %v770_v12, %v648_v27  ;;  %v809_v47 = vmax.f32 %v793_v40, 0.0  ;;  %v801_v48 = vadd.f32 %v774_v28, %v689_v45  ;;  %v691_v50 = vpop.f32.mrb[7].mxu1  ;;  %v3724_v12 = vld [vmem:[#allocation9 + $0x388] ss:$16 sps:$4 sm:$0xff]  }
 0x177   :  { %2442 = vmatprep.subr.bf16.mxu0 %v3693_v20  ;;  %2614 = vmatprep.subr.bf16.mxu1 %v3696_v21  ;;  %v815_v36 = vmax.f32 %v799_v26, 0.0  ;;  %v810_v51 = vmax.f32 %v794_v44, 0.0  ;;  %v802_v52 = vadd.f32 %v778_v33, %v691_v50  ;;  %v3732_v16 = vld [vmem:[#allocation9 + $0x3ac] ss:$16 sps:$4 sm:$0xff]   ;;  %v3727_v17 = vld [vmem:[#allocation9 + $0x3a0] ss:$16 sps:$4 sm:$0xff]  }
 0x178   :  { %v816_v37 = vmax.f32 %v800_v32, 0.0  ;;  %v817_v53 = vmax.f32 %v801_v48, 0.0  ;;  %v3738_v20 = vld [vmem:[#allocation9 + $0x3cc] ss:$16 sps:$4 sm:$0xff]   ;;  %v3733_v21 = vld [vmem:[#allocation9 + $0x3c0] ss:$16 sps:$4 sm:$0xff]  }
 0x179   :  { %v4270_v39 = vpack.c.bf16 %v815_v36, %v807_v25  ;;  %v818_v56 = vmax.f32 %v802_v52, 0.0  ;;  %v3736_v22 = vld [vmem:[#allocation9 + $0x3c8] ss:$16 sps:$4 sm:$0xff]   ;;  %v3744_v5 = vld [vmem:[#allocation9 + $0x3ec] ss:$16 sps:$4 sm:$0xff]  }
 0x17a   :  { %2443 = vmatpush1.bf16.msra.mxu0 %v3691_v29  ;;  %2615 = vmatpush1.bf16.msra.mxu1 %v3694_v30  ;;  %v4272_v43 = vpack.c.bf16 %v816_v37, %v808_v31  ;;  %v4274_v59 = vpack.c.bf16 %v817_v53, %v809_v47  ;;  %v3739_v24 = vld [vmem:[#allocation9 + $0x3e0] ss:$16 sps:$4 sm:$0xff]   ;;  %v3742_v25 = vld [vmem:[#allocation9 + $0x3e8] ss:$16 sps:$4 sm:$0xff]   ;;  %v3747_v26 = vld [vmem:[#allocation9 + $0x404] ss:$16 sps:$4 sm:$0xff]  }
 0x17b   :  { %2444 = vmatprep.subr.bf16.mxu0 %v3699_v34  ;;  %2616 = vmatprep.subr.bf16.mxu1 %v3702_v35  ;;  %v4276_v60 = vpack.c.bf16 %v818_v56, %v810_v51  ;;  %v3750_v27 = vld [vmem:[#allocation9 + $0x40c] ss:$16 sps:$4 sm:$0xff]   ;;  %v3745_v28 = vld [vmem:[#allocation9 + $0x400] ss:$16 sps:$4 sm:$0xff]   ;;  %v3748_v29 = vld [vmem:[#allocation9 + $0x408] ss:$16 sps:$4 sm:$0xff]  }
 0x17c   :  { %v3753_v30 = vld [vmem:[#allocation9 + $0x424] ss:$16 sps:$4 sm:$0xff]   ;;  %v3756_v31 = vld [vmem:[#allocation9 + $0x42c] ss:$16 sps:$4 sm:$0xff]   ;;  %v3751_v32 = vld [vmem:[#allocation9 + $0x420] ss:$16 sps:$4 sm:$0xff]  }
 0x17d   :  { %v3754_v33 = vld [vmem:[#allocation9 + $0x428] ss:$16 sps:$4 sm:$0xff]   ;;  %v3759_v34 = vld [vmem:[#allocation9 + $0x444] ss:$16 sps:$4 sm:$0xff]   ;;  %v3762_v35 = vld [vmem:[#allocation9 + $0x44c] ss:$16 sps:$4 sm:$0xff]  }
 0x17e   :  { %2445 = vmatpush1.bf16.msra.mxu0 %v3697_v0  ;;  %2617 = vmatpush1.bf16.msra.mxu1 %v3700_v42  ;;  %v3757_v36 = vld [vmem:[#allocation9 + $0x440] ss:$16 sps:$4 sm:$0xff]   ;;  %v3760_v37 = vld [vmem:[#allocation9 + $0x448] ss:$16 sps:$4 sm:$0xff]   ;;  %v3765_v38 = vld [vmem:[#allocation9 + $0x464] ss:$16 sps:$4 sm:$0xff]  }
 0x17f   :  { %2446 = vmatprep.subr.bf16.mxu0 %v3705_v9  ;;  %2618 = vmatprep.subr.bf16.mxu1 %v3708_v46  ;;  %v3763_v40 = vld [vmem:[#allocation9 + $0x460] ss:$16 sps:$4 sm:$0xff]   ;;  %v3766_v41 = vld [vmem:[#allocation9 + $0x468] ss:$16 sps:$4 sm:$0xff]   ;;  %v3771_v0 = vld [vmem:[#allocation9 + $0x484] ss:$16 sps:$4 sm:$0xff]  }
 0x180   :  { %v3774_v42 = vld [vmem:[#allocation9 + $0x48c] ss:$16 sps:$4 sm:$0xff]   ;;  %v3769_v44 = vld [vmem:[#allocation9 + $0x480] ss:$16 sps:$4 sm:$0xff]   ;;  %v3777_v45 = vld [vmem:[#allocation9 + $0x4a4] ss:$16 sps:$4 sm:$0xff]  }
 0x181   :  { %v3780_v9 = vld [vmem:[#allocation9 + $0x4ac] ss:$16 sps:$4 sm:$0xff]   ;;  %v3775_v46 = vld [vmem:[#allocation9 + $0x4a0] ss:$16 sps:$4 sm:$0xff]   ;;  %v3778_v47 = vld [vmem:[#allocation9 + $0x4a8] ss:$16 sps:$4 sm:$0xff]  }
 0x182   :  { %2447 = vmatpush1.bf16.msra.mxu0 %v3703_v54  ;;  %2619 = vmatpush1.bf16.msra.mxu1 %v3706_v55  ;;  %v3783_v48 = vld [vmem:[#allocation9 + $0x4c4] ss:$16 sps:$4 sm:$0xff]   ;;  %v3786_v50 = vld [vmem:[#allocation9 + $0x4cc] ss:$16 sps:$4 sm:$0xff]   ;;  %v3781_v51 = vld [vmem:[#allocation9 + $0x4c0] ss:$16 sps:$4 sm:$0xff]  }
 0x183   :  { %2448 = vmatprep.subr.bf16.mxu0 %v3711_v57  ;;  %2620 = vmatprep.subr.bf16.mxu1 %v3714_v58  ;;  %v3784_v52 = vld [vmem:[#allocation9 + $0x4c8] ss:$16 sps:$4 sm:$0xff]   ;;  %v3789_v53 = vld [vmem:[#allocation9 + $0x4e4] ss:$16 sps:$4 sm:$0xff]   ;;  %v3792_v54 = vld [vmem:[#allocation9 + $0x4ec] ss:$16 sps:$4 sm:$0xff]  }
 0x184   :  { %v3787_v55 = vld [vmem:[#allocation9 + $0x4e0] ss:$16 sps:$4 sm:$0xff]   ;;  %v3790_v56 = vld [vmem:[#allocation9 + $0x4e8] ss:$16 sps:$4 sm:$0xff]   ;;  %v3795_v57 = vld [vmem:[#allocation9 + $0x504] ss:$16 sps:$4 sm:$0xff]  }
 0x185   :  { %v3798_v58 = vld [vmem:[#allocation9 + $0x50c] ss:$16 sps:$4 sm:$0xff]  }
 0x186   :  { %2449 = vmatpush1.bf16.msra.mxu0 %v3709_v61  ;;  %2621 = vmatpush1.bf16.msra.mxu1 %v3712_v62  ;;  %v3793_v61 = vld [vmem:[#allocation9 + $0x500] ss:$16 sps:$4 sm:$0xff]   ;;  %v3796_v62 = vld [vmem:[#allocation9 + $0x508] ss:$16 sps:$4 sm:$0xff]  }
 0x187   :  { %2450 = vmatprep.subr.bf16.mxu0 %v3717_v63  ;;  %2622 = vmatprep.subr.bf16.mxu1 %v3720_v1  ;;  %v3801_v63 = vld [vmem:[#allocation9 + $0x524] ss:$16 sps:$4 sm:$0xff]   ;;  %v3804_v1 = vld [vmem:[#allocation9 + $0x52c] ss:$16 sps:$4 sm:$0xff]  }
 0x18a   :  { %2451 = vmatpush1.bf16.msra.mxu0 %v3715_v2  ;;  %2623 = vmatpush1.bf16.msra.mxu1 %v3718_v3  ;;  %v3799_v2 = vld [vmem:[#allocation9 + $0x520] ss:$16 sps:$4 sm:$0xff]   ;;  %v3802_v3 = vld [vmem:[#allocation9 + $0x528] ss:$16 sps:$4 sm:$0xff]  }
 0x18b   :  { %2452 = vmatprep.subr.bf16.mxu0 %v3723_v4  ;;  %2624 = vmatprep.subr.bf16.mxu1 %v3726_v6  ;;  %v3807_v4 = vld [vmem:[#allocation9 + $0x544] ss:$16 sps:$4 sm:$0xff]   ;;  %v3810_v6 = vld [vmem:[#allocation9 + $0x54c] ss:$16 sps:$4 sm:$0xff]  }
 0x18e   :  { %2453 = vmatpush1.bf16.msra.mxu0 %v3721_v11  ;;  %2625 = vmatpush1.bf16.msra.mxu1 %v3724_v12  ;;  %v3805_v11 = vld [vmem:[#allocation9 + $0x540] ss:$16 sps:$4 sm:$0xff]   ;;  %v3808_v12 = vld [vmem:[#allocation9 + $0x548] ss:$16 sps:$4 sm:$0xff]  }
 0x18f   :  { %2454 = vmatprep.subr.bf16.mxu0 %v3729_v14  ;;  %2626 = vmatprep.subr.bf16.mxu1 %v3732_v16  ;;  %v3813_v14 = vld [vmem:[#allocation9 + $0x564] ss:$16 sps:$4 sm:$0xff]   ;;  %v3816_v16 = vld [vmem:[#allocation9 + $0x56c] ss:$16 sps:$4 sm:$0xff]  }
 0x192   :  { %2455 = vmatpush1.bf16.msra.mxu0 %v3727_v17  ;;  %2627 = vmatpush1.bf16.msra.mxu1 %v3730_v18  ;;  %v3811_v17 = vld [vmem:[#allocation9 + $0x560] ss:$16 sps:$4 sm:$0xff]   ;;  %v3814_v18 = vld [vmem:[#allocation9 + $0x568] ss:$16 sps:$4 sm:$0xff]  }
 0x193   :  { %2456 = vmatprep.subr.bf16.mxu0 %v3735_v19  ;;  %2628 = vmatprep.subr.bf16.mxu1 %v3738_v20  ;;  %v3819_v19 = vld [vmem:[#allocation9 + $0x584] ss:$16 sps:$4 sm:$0xff]   ;;  %v3822_v20 = vld [vmem:[#allocation9 + $0x58c] ss:$16 sps:$4 sm:$0xff]  }
 0x196   :  { %2457 = vmatpush1.bf16.msra.mxu0 %v3733_v21  ;;  %2629 = vmatpush1.bf16.msra.mxu1 %v3736_v22  ;;  %v3817_v21 = vld [vmem:[#allocation9 + $0x580] ss:$16 sps:$4 sm:$0xff]   ;;  %v3820_v22 = vld [vmem:[#allocation9 + $0x588] ss:$16 sps:$4 sm:$0xff]  }
 0x197   :  { %2458 = vmatprep.subr.bf16.mxu0 %v3741_v23  ;;  %2630 = vmatprep.subr.bf16.mxu1 %v3744_v5  ;;  %v3825_v23 = vld [vmem:[#allocation9 + $0x5a4] ss:$16 sps:$4 sm:$0xff]   ;;  %v3828_v5 = vld [vmem:[#allocation9 + $0x5ac] ss:$16 sps:$4 sm:$0xff]  }
 0x19a   :  { %2459 = vmatpush1.bf16.msra.mxu0 %v3739_v24  ;;  %2631 = vmatpush1.bf16.msra.mxu1 %v3742_v25  ;;  %v3823_v24 = vld [vmem:[#allocation9 + $0x5a0] ss:$16 sps:$4 sm:$0xff]   ;;  %v3826_v25 = vld [vmem:[#allocation9 + $0x5a8] ss:$16 sps:$4 sm:$0xff]  }
 0x19b   :  { %2471 = vmatprep.subr.bf16.mxu0 %v3747_v26  ;;  %2643 = vmatprep.subr.bf16.mxu1 %v3750_v27  ;;  %v3831_v26 = vld [vmem:[#allocation9 + $0x5c4] ss:$16 sps:$4 sm:$0xff]   ;;  %v3834_v27 = vld [vmem:[#allocation9 + $0x5cc] ss:$16 sps:$4 sm:$0xff]  }
 0x19d   :  { %2461 = vmatmul.mubr.bf16.vlgmr.msra.gmra.mrb[8].mxu0 %v4260_v49  ;;  %2633 = vmatmul.mubr.bf16.vlgmr.msra.gmra.mrb[8].mxu1 %v4260_v49  ;;  %v3768_v49 = vld [vmem:[#allocation9 + $0x46c] ss:$16 sps:$4 sm:$0xff]  }
 0x19e   :  { %2472 = vmatpush1.bf16.msra.mxu0 %v3745_v28  ;;  %2644 = vmatpush1.bf16.msra.mxu1 %v3748_v29  ;;  %v3829_v28 = vld [vmem:[#allocation9 + $0x5c0] ss:$16 sps:$4 sm:$0xff]   ;;  %v3832_v29 = vld [vmem:[#allocation9 + $0x5c8] ss:$16 sps:$4 sm:$0xff]  }
 0x19f   :  { %2473 = vmatprep.subr.bf16.mxu0 %v3753_v30  ;;  %2645 = vmatprep.subr.bf16.mxu1 %v3756_v31  ;;  %v3837_v30 = vld [vmem:[#allocation9 + $0x5e4] ss:$16 sps:$4 sm:$0xff]   ;;  %v3840_v31 = vld [vmem:[#allocation9 + $0x5ec] ss:$16 sps:$4 sm:$0xff]  }
 0x1a0   :  { %2503 = vmatprep.mubr.bf16.mxu0 %v4272_v43  ;;  %2675 = vmatprep.mubr.bf16.mxu1 %v4272_v43  ;;  %v3772_v43 = vld [vmem:[#allocation9 + $0x488] ss:$16 sps:$4 sm:$0xff]  }
 0x1a2   :  { %2474 = vmatpush1.bf16.msra.mxu0 %v3751_v32  ;;  %2646 = vmatpush1.bf16.msra.mxu1 %v3754_v33  ;;  %v3835_v32 = vld [vmem:[#allocation9 + $0x5e0] ss:$16 sps:$4 sm:$0xff]   ;;  %v3838_v33 = vld [vmem:[#allocation9 + $0x5e8] ss:$16 sps:$4 sm:$0xff]  }
 0x1a3   :  { %2475 = vmatprep.subr.bf16.mxu0 %v3759_v34  ;;  %2647 = vmatprep.subr.bf16.mxu1 %v3762_v35  ;;  %v3843_v34 = vld [vmem:[#allocation9 + $0x604] ss:$16 sps:$4 sm:$0xff]   ;;  %v3846_v35 = vld [vmem:[#allocation9 + $0x60c] ss:$16 sps:$4 sm:$0xff]  }
 0x1a6   :  { %2476 = vmatpush1.bf16.msra.mxu0 %v3757_v36  ;;  %2648 = vmatpush1.bf16.msra.mxu1 %v3760_v37  ;;  %v3841_v36 = vld [vmem:[#allocation9 + $0x600] ss:$16 sps:$4 sm:$0xff]   ;;  %v3844_v37 = vld [vmem:[#allocation9 + $0x608] ss:$16 sps:$4 sm:$0xff]  }
 0x1a7   :  { %2477 = vmatprep.subr.bf16.mxu0 %v3765_v38  ;;  %2649 = vmatprep.subr.bf16.mxu1 %v3768_v49  ;;  %v3849_v38 = vld [vmem:[#allocation9 + $0x624] ss:$16 sps:$4 sm:$0xff]   ;;  %v3852_v49 = vld [vmem:[#allocation9 + $0x62c] ss:$16 sps:$4 sm:$0xff]  }
 0x1aa   :  { %2478 = vmatpush1.bf16.msra.mxu0 %v3763_v40  ;;  %2650 = vmatpush1.bf16.msra.mxu1 %v3766_v41  ;;  %v3847_v40 = vld [vmem:[#allocation9 + $0x620] ss:$16 sps:$4 sm:$0xff]   ;;  %v3850_v41 = vld [vmem:[#allocation9 + $0x628] ss:$16 sps:$4 sm:$0xff]  }
 0x1ab   :  { %2479 = vmatprep.subr.bf16.mxu0 %v3771_v0  ;;  %2651 = vmatprep.subr.bf16.mxu1 %v3774_v42  ;;  %v3855_v0 = vld [vmem:[#allocation9 + $0x644] ss:$16 sps:$4 sm:$0xff]   ;;  %v3858_v42 = vld [vmem:[#allocation9 + $0x64c] ss:$16 sps:$4 sm:$0xff]  }
 0x1ae   :  { %2480 = vmatpush1.bf16.msra.mxu0 %v3769_v44  ;;  %2652 = vmatpush1.bf16.msra.mxu1 %v3772_v43  ;;  %v3853_v44 = vld [vmem:[#allocation9 + $0x640] ss:$16 sps:$4 sm:$0xff]   ;;  %v3856_v43 = vld [vmem:[#allocation9 + $0x648] ss:$16 sps:$4 sm:$0xff]  }
 0x1af   :  { %2481 = vmatprep.subr.bf16.mxu0 %v3777_v45  ;;  %2653 = vmatprep.subr.bf16.mxu1 %v3780_v9  ;;  %v3861_v45 = vld [vmem:[#allocation9 + $0x664] ss:$16 sps:$4 sm:$0xff]   ;;  %v3859_v9 = vld [vmem:[#allocation9 + $0x660] ss:$16 sps:$4 sm:$0xff]  }
 0x1b2   :  { %2482 = vmatpush1.bf16.msra.mxu0 %v3775_v46  ;;  %2654 = vmatpush1.bf16.msra.mxu1 %v3778_v47  ;;  %v3862_v46 = vld [vmem:[#allocation9 + $0x668] ss:$16 sps:$4 sm:$0xff]   ;;  %v3867_v47 = vld [vmem:[#allocation9 + $0x684] ss:$16 sps:$4 sm:$0xff]  }
 0x1b3   :  { %2483 = vmatprep.subr.bf16.mxu0 %v3783_v48  ;;  %2655 = vmatprep.subr.bf16.mxu1 %v3786_v50  ;;  %v3870_v48 = vld [vmem:[#allocation9 + $0x68c] ss:$16 sps:$4 sm:$0xff]   ;;  %v3865_v50 = vld [vmem:[#allocation9 + $0x680] ss:$16 sps:$4 sm:$0xff]  }
 0x1b6   :  { %2484 = vmatpush1.bf16.msra.mxu0 %v3781_v51  ;;  %2656 = vmatpush1.bf16.msra.mxu1 %v3784_v52  ;;  %v3873_v51 = vld [vmem:[#allocation9 + $0x6a4] ss:$16 sps:$4 sm:$0xff]   ;;  %v3876_v52 = vld [vmem:[#allocation9 + $0x6ac] ss:$16 sps:$4 sm:$0xff]  }
 0x1b7   :  { %2485 = vmatprep.subr.bf16.mxu0 %v3789_v53  ;;  %2657 = vmatprep.subr.bf16.mxu1 %v3792_v54  ;;  %v3871_v53 = vld [vmem:[#allocation9 + $0x6a0] ss:$16 sps:$4 sm:$0xff]   ;;  %v3874_v54 = vld [vmem:[#allocation9 + $0x6a8] ss:$16 sps:$4 sm:$0xff]  }
 0x1ba   :  { %2486 = vmatpush1.bf16.msra.mxu0 %v3787_v55  ;;  %2658 = vmatpush1.bf16.msra.mxu1 %v3790_v56  ;;  %v3879_v55 = vld [vmem:[#allocation9 + $0x6c4] ss:$16 sps:$4 sm:$0xff]   ;;  %v3882_v56 = vld [vmem:[#allocation9 + $0x6cc] ss:$16 sps:$4 sm:$0xff]  }
 0x1bb   :  { %2487 = vmatprep.subr.bf16.mxu0 %v3795_v57  ;;  %2659 = vmatprep.subr.bf16.mxu1 %v3798_v58  ;;  %v3877_v57 = vld [vmem:[#allocation9 + $0x6c0] ss:$16 sps:$4 sm:$0xff]   ;;  %v3880_v58 = vld [vmem:[#allocation9 + $0x6c8] ss:$16 sps:$4 sm:$0xff]  }
 0x1be   :  { %2488 = vmatpush1.bf16.msra.mxu0 %v3793_v61  ;;  %2660 = vmatpush1.bf16.msra.mxu1 %v3796_v62  ;;  %v3885_v61 = vld [vmem:[#allocation9 + $0x6e4] ss:$16 sps:$4 sm:$0xff]   ;;  %v3888_v62 = vld [vmem:[#allocation9 + $0x6ec] ss:$16 sps:$4 sm:$0xff]  }
 0x1bf   :  { %2489 = vmatprep.subr.bf16.mxu0 %v3801_v63  ;;  %2661 = vmatprep.subr.bf16.mxu1 %v3804_v1  ;;  %v3883_v63 = vld [vmem:[#allocation9 + $0x6e0] ss:$16 sps:$4 sm:$0xff]   ;;  %v3886_v1 = vld [vmem:[#allocation9 + $0x6e8] ss:$16 sps:$4 sm:$0xff]  }
 0x1c2   :  { %2490 = vmatpush1.bf16.msra.mxu0 %v3799_v2  ;;  %2662 = vmatpush1.bf16.msra.mxu1 %v3802_v3  ;;  %v3891_v2 = vld [vmem:[#allocation9 + $0x704] ss:$16 sps:$4 sm:$0xff]   ;;  %v3894_v3 = vld [vmem:[#allocation9 + $0x70c] ss:$16 sps:$4 sm:$0xff]  }
 0x1c3   :  { %2491 = vmatprep.subr.bf16.mxu0 %v3807_v4  ;;  %2663 = vmatprep.subr.bf16.mxu1 %v3810_v6  ;;  %v3889_v4 = vld [vmem:[#allocation9 + $0x700] ss:$16 sps:$4 sm:$0xff]   ;;  %v3892_v6 = vld [vmem:[#allocation9 + $0x708] ss:$16 sps:$4 sm:$0xff]  }
 0x1c6   :  { %2492 = vmatpush1.bf16.msra.mxu0 %v3805_v11  ;;  %2664 = vmatpush1.bf16.msra.mxu1 %v3808_v12  ;;  %v3897_v11 = vld [vmem:[#allocation9 + $0x724] ss:$16 sps:$4 sm:$0xff]   ;;  %v3900_v12 = vld [vmem:[#allocation9 + $0x72c] ss:$16 sps:$4 sm:$0xff]  }
 0x1c7   :  { %2493 = vmatprep.subr.bf16.mxu0 %v3813_v14  ;;  %2665 = vmatprep.subr.bf16.mxu1 %v3816_v16  ;;  %v3895_v14 = vld [vmem:[#allocation9 + $0x720] ss:$16 sps:$4 sm:$0xff]   ;;  %v3898_v16 = vld [vmem:[#allocation9 + $0x728] ss:$16 sps:$4 sm:$0xff]  }
 0x1ca   :  { %2494 = vmatpush1.bf16.msra.mxu0 %v3811_v17  ;;  %2666 = vmatpush1.bf16.msra.mxu1 %v3814_v18  ;;  %v3903_v17 = vld [vmem:[#allocation9 + $0x744] ss:$16 sps:$4 sm:$0xff]   ;;  %v3906_v18 = vld [vmem:[#allocation9 + $0x74c] ss:$16 sps:$4 sm:$0xff]  }
 0x1cb   :  { %2495 = vmatprep.subr.bf16.mxu0 %v3819_v19  ;;  %2667 = vmatprep.subr.bf16.mxu1 %v3822_v20  ;;  %v3901_v19 = vld [vmem:[#allocation9 + $0x740] ss:$16 sps:$4 sm:$0xff]   ;;  %v3904_v20 = vld [vmem:[#allocation9 + $0x748] ss:$16 sps:$4 sm:$0xff]  }
 0x1ce   :  { %2496 = vmatpush1.bf16.msra.mxu0 %v3817_v21  ;;  %2668 = vmatpush1.bf16.msra.mxu1 %v3820_v22  ;;  %v3909_v21 = vld [vmem:[#allocation9 + $0x764] ss:$16 sps:$4 sm:$0xff]   ;;  %v3912_v22 = vld [vmem:[#allocation9 + $0x76c] ss:$16 sps:$4 sm:$0xff]  }
 0x1cf   :  { %2497 = vmatprep.subr.bf16.mxu0 %v3825_v23  ;;  %2669 = vmatprep.subr.bf16.mxu1 %v3828_v5  ;;  %v3907_v23 = vld [vmem:[#allocation9 + $0x760] ss:$16 sps:$4 sm:$0xff]   ;;  %v3910_v5 = vld [vmem:[#allocation9 + $0x768] ss:$16 sps:$4 sm:$0xff]  }
 0x1d2   :  { %2498 = vmatpush1.bf16.msra.mxu0 %v3823_v24  ;;  %2670 = vmatpush1.bf16.msra.mxu1 %v3826_v25  ;;  %v3915_v24 = vld [vmem:[#allocation9 + $0x784] ss:$16 sps:$4 sm:$0xff]   ;;  %v3918_v25 = vld [vmem:[#allocation9 + $0x78c] ss:$16 sps:$4 sm:$0xff]  }
 0x1d3   :  { %2499 = vmatprep.subr.bf16.mxu0 %v3831_v26  ;;  %2671 = vmatprep.subr.bf16.mxu1 %v3834_v27  ;;  %v3913_v26 = vld [vmem:[#allocation9 + $0x780] ss:$16 sps:$4 sm:$0xff]   ;;  %v3916_v27 = vld [vmem:[#allocation9 + $0x788] ss:$16 sps:$4 sm:$0xff]  }
 0x1d6   :  { %2500 = vmatpush1.bf16.msra.mxu0 %v3829_v28  ;;  %2672 = vmatpush1.bf16.msra.mxu1 %v3832_v29  ;;  %v3921_v28 = vld [vmem:[#allocation9 + $0x7a4] ss:$16 sps:$4 sm:$0xff]   ;;  %v3924_v29 = vld [vmem:[#allocation9 + $0x7ac] ss:$16 sps:$4 sm:$0xff]  }
 0x1d7   :  { %2501 = vmatprep.subr.bf16.mxu0 %v3837_v30  ;;  %2673 = vmatprep.subr.bf16.mxu1 %v3840_v31  ;;  %v3919_v30 = vld [vmem:[#allocation9 + $0x7a0] ss:$16 sps:$4 sm:$0xff]   ;;  %v3922_v31 = vld [vmem:[#allocation9 + $0x7a8] ss:$16 sps:$4 sm:$0xff]  }
 0x1da   :  { %2502 = vmatpush1.bf16.msra.mxu0 %v3835_v32  ;;  %2674 = vmatpush1.bf16.msra.mxu1 %v3838_v33  ;;  %v3927_v32 = vld [vmem:[#allocation9 + $0x7c4] ss:$16 sps:$4 sm:$0xff]   ;;  %v3930_v33 = vld [vmem:[#allocation9 + $0x7cc] ss:$16 sps:$4 sm:$0xff]  }
 0x1db   :  { %2514 = vmatprep.subr.bf16.mxu0 %v3843_v34  ;;  %2686 = vmatprep.subr.bf16.mxu1 %v3846_v35  ;;  %v3925_v34 = vld [vmem:[#allocation9 + $0x7c0] ss:$16 sps:$4 sm:$0xff]   ;;  %v3928_v35 = vld [vmem:[#allocation9 + $0x7c8] ss:$16 sps:$4 sm:$0xff]  }
 0x1dd   :  { %2504 = vmatmul.mubr.bf16.vlgmr.msra.gmra.mrb[8].mxu0 %v4270_v39  ;;  %2676 = vmatmul.mubr.bf16.vlgmr.msra.gmra.mrb[8].mxu1 %v4270_v39  ;;  %v3864_v39 = vld [vmem:[#allocation9 + $0x66c] ss:$16 sps:$4 sm:$0xff]  }
 0x1de   :  { %2515 = vmatpush1.bf16.msra.mxu0 %v3841_v36  ;;  %2687 = vmatpush1.bf16.msra.mxu1 %v3844_v37  ;;  %v3933_v36 = vld [vmem:[#allocation9 + $0x7e4] ss:$16 sps:$4 sm:$0xff]   ;;  %v3936_v37 = vld [vmem:[#allocation9 + $0x7ec] ss:$16 sps:$4 sm:$0xff]  }
 0x1df   :  { %2516 = vmatprep.subr.bf16.mxu0 %v3849_v38  ;;  %2688 = vmatprep.subr.bf16.mxu1 %v3852_v49  ;;  %v3931_v38 = vld [vmem:[#allocation9 + $0x7e0] ss:$16 sps:$4 sm:$0xff]   ;;  %v3934_v49 = vld [vmem:[#allocation9 + $0x7e8] ss:$16 sps:$4 sm:$0xff]  }
 0x1e0   :  { %2546 = vmatprep.mubr.bf16.mxu0 %v4276_v60  ;;  %2718 = vmatprep.mubr.bf16.mxu1 %v4276_v60  ;;  %v3868_v60 = vld [vmem:[#allocation9 + $0x688] ss:$16 sps:$4 sm:$0xff]  }
 0x1e2   :  { %2517 = vmatpush1.bf16.msra.mxu0 %v3847_v40  ;;  %2689 = vmatpush1.bf16.msra.mxu1 %v3850_v41  ;;  %v3937_v40 = vld [vmem:[#allocation11 + $0x40] sm:$0xff]  }
 0x1e3   :  { %2518 = vmatprep.subr.bf16.mxu0 %v3855_v0  ;;  %2690 = vmatprep.subr.bf16.mxu1 %v3858_v42  ;;  %v3938_v41 = vld [vmem:[#allocation11 + $0xc0] sm:$0xff]  }
 0x1e4   :  { %v3939_v0 = vld [vmem:[#allocation11] sm:$0xff]  }
 0x1e5   :  { %v3940_v42 = vld [vmem:[#allocation11 + $0x80] sm:$0xff]  }
 0x1e6   :  { %2519 = vmatpush1.bf16.msra.mxu0 %v3853_v44  ;;  %2691 = vmatpush1.bf16.msra.mxu1 %v3856_v43  ;;  %v3941_v44 = vld [vmem:[#allocation11 + $0x48] sm:$0xff]  }
 0x1e7   :  { %2520 = vmatprep.subr.bf16.mxu0 %v3861_v45  ;;  %2692 = vmatprep.subr.bf16.mxu1 %v3864_v39  ;;  %v3942_v43 = vld [vmem:[#allocation11 + $0xc8] sm:$0xff]  }
 0x1e8   :  { %v3943_v45 = vld [vmem:[#allocation11 + $0x8] sm:$0xff]  }
 0x1e9   :  { %v3944_v39 = vld [vmem:[#allocation11 + $0x88] sm:$0xff]  }
 0x1ea   :  { %2521 = vmatpush1.bf16.msra.mxu0 %v3859_v9  ;;  %2693 = vmatpush1.bf16.msra.mxu1 %v3862_v46  ;;  %v3945_v9 = vld [vmem:[#allocation11 + $0x50] sm:$0xff]  }
 0x1eb   :  { %2522 = vmatprep.subr.bf16.mxu0 %v3867_v47  ;;  %2694 = vmatprep.subr.bf16.mxu1 %v3870_v48  ;;  %v3946_v46 = vld [vmem:[#allocation11 + $0xd0] sm:$0xff]  }
 0x1ec   :  { %v3947_v47 = vld [vmem:[#allocation11 + $0x10] sm:$0xff]  }
 0x1ed   :  { %v3948_v48 = vld [vmem:[#allocation11 + $0x90] sm:$0xff]  }
 0x1ee   :  { %2523 = vmatpush1.bf16.msra.mxu0 %v3865_v50  ;;  %2695 = vmatpush1.bf16.msra.mxu1 %v3868_v60  ;;  %v3949_v50 = vld [vmem:[#allocation11 + $0x58] sm:$0xff]  }
 0x1ef   :  { %2524 = vmatprep.subr.bf16.mxu0 %v3873_v51  ;;  %2696 = vmatprep.subr.bf16.mxu1 %v3876_v52  ;;  %v3950_v60 = vld [vmem:[#allocation11 + $0xd8] sm:$0xff]   ;;  %v3953_v52 = vld [vmem:[#allocation11 + $0x60] sm:$0xff]  }
 0x1f0   :  { %v3951_v51 = vld [vmem:[#allocation11 + $0x18] sm:$0xff]  }
 0x1f2   :  { %2525 = vmatpush1.bf16.msra.mxu0 %v3871_v53  ;;  %2697 = vmatpush1.bf16.msra.mxu1 %v3874_v54  ;;  %v3954_v53 = vld [vmem:[#allocation11 + $0xe0] sm:$0xff]  }
 0x1f3   :  { %2526 = vmatprep.subr.bf16.mxu0 %v3879_v55  ;;  %2698 = vmatprep.subr.bf16.mxu1 %v3882_v56  ;;  %v3955_v54 = vld [vmem:[#allocation11 + $0x20] sm:$0xff]   ;;  %v3957_v56 = vld [vmem:[#allocation11 + $0x68] sm:$0xff]  }
 0x1f4   :  { %v3956_v55 = vld [vmem:[#allocation11 + $0xa0] sm:$0xff]  }
 0x1f6   :  { %2527 = vmatpush1.bf16.msra.mxu0 %v3877_v57  ;;  %2699 = vmatpush1.bf16.msra.mxu1 %v3880_v58  ;;  %v3958_v57 = vld [vmem:[#allocation11 + $0xe8] sm:$0xff]  }
 0x1f7   :  { %2528 = vmatprep.subr.bf16.mxu0 %v3885_v61  ;;  %2700 = vmatprep.subr.bf16.mxu1 %v3888_v62  ;;  %v3959_v58 = vld [vmem:[#allocation11 + $0x28] sm:$0xff]   ;;  %v3961_v62 = vld [vmem:[#allocation11 + $0x70] sm:$0xff]  }
 0x1f8   :  { %v3960_v61 = vld [vmem:[#allocation11 + $0xa8] sm:$0xff]  }
 0x1fa   :  { %2529 = vmatpush1.bf16.msra.mxu0 %v3883_v63  ;;  %2701 = vmatpush1.bf16.msra.mxu1 %v3886_v1  ;;  %v3962_v63 = vld [vmem:[#allocation11 + $0xf0] sm:$0xff]  }
 0x1fb   :  { %2530 = vmatprep.subr.bf16.mxu0 %v3891_v2  ;;  %2702 = vmatprep.subr.bf16.mxu1 %v3894_v3  ;;  %v3963_v1 = vld [vmem:[#allocation11 + $0x30] sm:$0xff]   ;;  %v3965_v3 = vld [vmem:[#allocation11 + $0x78] sm:$0xff]  }
 0x1fc   :  { %v3964_v2 = vld [vmem:[#allocation11 + $0xb0] sm:$0xff]  }
 0x1fe   :  { %2531 = vmatpush1.bf16.msra.mxu0 %v3889_v4  ;;  %2703 = vmatpush1.bf16.msra.mxu1 %v3892_v6  ;;  %v3966_v4 = vld [vmem:[#allocation11 + $0xf8] sm:$0xff]  }
 0x1ff   :  { %2532 = vmatprep.subr.bf16.mxu0 %v3897_v11  ;;  %2704 = vmatprep.subr.bf16.mxu1 %v3900_v12  ;;  %v3967_v6 = vld [vmem:[#allocation11 + $0x38] sm:$0xff]   ;;  %v1083_v12 = vld [vmem:[%s4318_s4] sm:$0xf] }
 0x200   :  { %v3968_v11 = vld [vmem:[#allocation11 + $0xb8] sm:$0xff]  }
 0x202   :  { %2533 = vmatpush1.bf16.msra.mxu0 %v3895_v14  ;;  %2705 = vmatpush1.bf16.msra.mxu1 %v3898_v16  ;;  %v1088_v14 = vrot.slane %v1083_v12, %v749_v8  ;;  %v1096_v16 = vrot.slane %v1083_v12, %v757_v13 }
 0x203   :  { %2534 = vmatprep.subr.bf16.mxu0 %v3903_v17  ;;  %2706 = vmatprep.subr.bf16.mxu1 %v3906_v18  ;;  %v1092_v17 = vrot.slane %v1083_v12, %v753_v10  ;;  %v1100_v18 = vrot.slane %v1083_v12, %v761_v15 }
 0x206   :  { %2535 = vmatpush1.bf16.msra.mxu0 %v3901_v19  ;;  %2707 = vmatpush1.bf16.msra.mxu1 %v3904_v20 }
 0x207   :  { %2536 = vmatprep.subr.bf16.mxu0 %v3909_v21  ;;  %2708 = vmatprep.subr.bf16.mxu1 %v3912_v22 }
 0x20a   :  { %2537 = vmatpush1.bf16.msra.mxu0 %v3907_v23  ;;  %2709 = vmatpush1.bf16.msra.mxu1 %v3910_v5 }
 0x20b   :  { %2538 = vmatprep.subr.bf16.mxu0 %v3915_v24  ;;  %2710 = vmatprep.subr.bf16.mxu1 %v3918_v25 }
 0x20e   :  { %2539 = vmatpush1.bf16.msra.mxu0 %v3913_v26  ;;  %2711 = vmatpush1.bf16.msra.mxu1 %v3916_v27 }
 0x20f   :  { %2540 = vmatprep.subr.bf16.mxu0 %v3921_v28  ;;  %2712 = vmatprep.subr.bf16.mxu1 %v3924_v29 }
 0x212   :  { %2541 = vmatpush1.bf16.msra.mxu0 %v3919_v30  ;;  %2713 = vmatpush1.bf16.msra.mxu1 %v3922_v31 }
 0x213   :  { %2542 = vmatprep.subr.bf16.mxu0 %v3927_v32  ;;  %2714 = vmatprep.subr.bf16.mxu1 %v3930_v33 }
 0x216   :  { %2543 = vmatpush1.bf16.msra.mxu0 %v3925_v34  ;;  %2715 = vmatpush1.bf16.msra.mxu1 %v3928_v35 }
 0x217   :  { %2544 = vmatprep.subr.bf16.mxu0 %v3933_v36  ;;  %2716 = vmatprep.subr.bf16.mxu1 %v3936_v37 }
 0x21a   :  { %2545 = vmatpush1.bf16.msra.mxu0 %v3931_v38  ;;  %2717 = vmatpush1.bf16.msra.mxu1 %v3934_v49 }
 0x21b   :  { %3461 = vmatprep.subr.bf16.mxu0 %v3937_v40  ;;  %3483 = vmatprep.subr.bf16.mxu1 %v3938_v41 }
 0x21d   :  { %2547 = vmatmul.mubr.bf16.vlgmr.msra.gmra.mrb[8].mxu0 %v4274_v59  ;;  %2719 = vmatmul.mubr.bf16.vlgmr.msra.gmra.mrb[8].mxu1 %v4274_v59  ;;  %v3952_v59 = vld [vmem:[#allocation11 + $0x98] sm:$0xff]  }
 0x21e   :  { %3462 = vmatpush3.bf16.msra.mxu0 %v3939_v0  ;;  %3484 = vmatpush3.bf16.msra.mxu1 %v3940_v42  ;;  %v3428_v42 = vld [vmem:[%s4320_s6] ss:$0 sm:$0xff]  ;;  %s4079_s6 = scalar_lea.vmem %s3094_s18, 256 }
 0x21f   :  { %3463 = vmatprep.subr.bf16.mxu0 %v3941_v44  ;;  %3485 = vmatprep.subr.bf16.mxu1 %v3942_v43  ;;  %p4080_p12 = scmp.ne.s32.totalorder %s3094_s18, %s4079_s6  ;;  %p4085_p0 = scmp.lt.s32.totalorder %s4079_s6, %s4079_s6 }
 0x221   :  { %p4086_p1 = por %p4085_p0, %p4084_p13 }
 0x222   :  { %3464 = vmatpush3.bf16.msra.mxu0 %v3943_v45  ;;  %3486 = vmatpush3.bf16.msra.mxu1 %v3944_v39 }
 0x223   :  { %3465 = vmatprep.subr.bf16.mxu0 %v3945_v9  ;;  %3487 = vmatprep.subr.bf16.mxu1 %v3946_v46  ;;  %p4087_p2 = pnand %p4086_p1, %p4080_p12 }
 0x226   :  { %3466 = vmatpush3.bf16.msra.mxu0 %v3947_v47  ;;  %3488 = vmatpush3.bf16.msra.mxu1 %v3948_v48 }
 0x227   :  { %3467 = vmatprep.subr.bf16.mxu0 %v3949_v50  ;;  %3489 = vmatprep.subr.bf16.mxu1 %v3950_v60 }
 0x22a   :  { %3468 = vmatpush3.bf16.msra.mxu0 %v3951_v51  ;;  %3490 = vmatpush3.bf16.msra.mxu1 %v3952_v59 }
 0x22b   :  { %3469 = vmatprep.subr.bf16.mxu0 %v3953_v52  ;;  %3491 = vmatprep.subr.bf16.mxu1 %v3954_v53 }
 0x22e   :  { %3470 = vmatpush3.bf16.msra.mxu0 %v3955_v54  ;;  %3492 = vmatpush3.bf16.msra.mxu1 %v3956_v55 }
 0x22f   :  { %3471 = vmatprep.subr.bf16.mxu0 %v3957_v56  ;;  %3493 = vmatprep.subr.bf16.mxu1 %v3958_v57 }
 0x232   :  { %3472 = vmatpush3.bf16.msra.mxu0 %v3959_v58  ;;  %3494 = vmatpush3.bf16.msra.mxu1 %v3960_v61 }
 0x233   :  { %3473 = vmatprep.subr.bf16.mxu0 %v3961_v62  ;;  %3495 = vmatprep.subr.bf16.mxu1 %v3962_v63 }
 0x236   :  { %3474 = vmatpush3.bf16.msra.mxu0 %v3963_v1  ;;  %3496 = vmatpush3.bf16.msra.mxu1 %v3964_v2 }
 0x237   :  { %3475 = vmatprep.subr.bf16.mxu0 %v3965_v3  ;;  %3497 = vmatprep.subr.bf16.mxu1 %v3966_v4 }
 0x23a   :  { %3476 = vmatpush3.bf16.msra.mxu0 %v3967_v6  ;;  %3498 = vmatpush3.bf16.msra.mxu1 %v3968_v11 }
 0x2f0   :  { %v2548_v19 = vpop.f32.mrb[8].mxu0  ;;  %v2720_v20 = vpop.f32.mrb[8].mxu1 }
 0x2f1   :  { %v3505_v21 = vadd.f32 %v2548_v19, %v1088_v14  ;;  %v3509_v22 = vadd.f32 %v2720_v20, %v1096_v16  ;;  %v2550_v23 = vpop.f32.mrb[9].mxu0  ;;  %v2722_v5 = vpop.f32.mrb[9].mxu1 }
 0x2f2   :  { %v3506_v24 = vadd.f32 %v2550_v23, %v1092_v17  ;;  %v3510_v25 = vadd.f32 %v2722_v5, %v1100_v18  ;;  %v2552_v26 = vpop.f32.mrb[10].mxu0  ;;  %v2724_v27 = vpop.f32.mrb[10].mxu1 }
 0x2f3   :  { %v3507_v8 = vadd.f32 %v2552_v26, %v1088_v14  ;;  %v3511_v28 = vadd.f32 %v2724_v27, %v1096_v16  ;;  %v2554_v29 = vpop.f32.mrb[11].mxu0  ;;  %v2726_v13 = vpop.f32.mrb[11].mxu1  ;;  %v2729_v10 = vmax.f32 %v3505_v21, 0.0  ;;  %v2731_v32 = vmax.f32 %v3509_v22, 0.0 }
 0x2f4   :  { %v3508_v30 = vadd.f32 %v2554_v29, %v1092_v17  ;;  %v3512_v31 = vadd.f32 %v2726_v13, %v1100_v18  ;;  %v2730_v33 = vmax.f32 %v3506_v24, 0.0  ;;  %v2732_v34 = vmax.f32 %v3510_v25, 0.0 }
 0x2f5   :  { %v2733_v7 = vmax.f32 %v3507_v8, 0.0  ;;  %v2735_v15 = vmax.f32 %v3511_v28, 0.0 }
 0x2f6   :  { %v2734_v35 = vmax.f32 %v3508_v30, 0.0  ;;  %v2736_v36 = vmax.f32 %v3512_v31, 0.0 }
 0x2f7   :  { %v2737_v37 = vpack.c.bf16 %v2733_v7, %v2729_v10  ;;  %v2739_v38 = vpack.c.bf16 %v2735_v15, %v2731_v32 }
 0x2f8   :  { %v2738_v49 = vpack.c.bf16 %v2734_v35, %v2730_v33  ;;  %v2740_v40 = vpack.c.bf16 %v2736_v36, %v2732_v34 }
 0x2fa   :  { %3036 = vmatprep.mubr.bf16.mxu0 %v2738_v49  ;;  %3077 = vmatprep.mubr.bf16.mxu1 %v2740_v40 }
 0x2fb   :  { %3037 = vmatmul.mubr.bf16.vlgmr.msra.gmra.mrb[12].mxu0 %v2737_v37  ;;  %3078 = vmatmul.mubr.bf16.vlgmr.msra.gmra.mrb[12].mxu1 %v2739_v38 }
 0x3ce   :  { %v3477_v41 = vpop.f32.mrb[12].mxu0  ;;  %v3499_v0 = vpop.f32.mrb[12].mxu1 }
 0x3cf   :  { %v3478_v44 = vpop.f32.mrb[13].mxu0  ;;  %v3500_v43 = vpop.f32.mrb[13].mxu1 }
 0x3d0   :  { %v3479_v45 = vadd.f32 %v3478_v44, %v3477_v41  ;;  %v3501_v39 = vadd.f32 %v3500_v43, %v3499_v0  ;;  %v3480_v9 = vpop.f32.mrb[14].mxu0  ;;  %v3502_v46 = vpop.f32.mrb[14].mxu1 }
 0x3d1   :  { %v3481_v47 = vpop.f32.mrb[15].mxu0  ;;  %v3503_v48 = vpop.f32.mrb[15].mxu1 }
 0x3d2   :  { %v3039_v50 = vadd.f32 %v3479_v45, %v3428_v42  ;;  %v3482_v60 = vadd.f32 %v3481_v47, %v3480_v9  ;;  %v3504_v51 = vadd.f32 %v3503_v48, %v3502_v46 }
 0x3d4   :  { %v3080_v59 = vadd.f32 %v3501_v39, %v3039_v50  ;;  %v3042_v52 = vadd.f32 %v3482_v60, %v3428_v42 }
 0x3d6   :  { %3086 = vst [vmem:[#allocation12] sm:$0xff] %v3080_v59  ;;  %v3083_v53 = vadd.f32 %v3504_v51, %v3042_v52 }
 0x3d8   :  { %3087 = vst [vmem:[#allocation12 + $0x8] sm:$0xff] %v3083_v53 }
 0x3d9   :  { %4090 = shalt.err (!%p4087_p2)
}
 0x3da   :  { %s4091_s21 = scalar_lea.hbm %s4321_s7, 256 }
 0x3db   :  { %p4092_p3 = scmp.ne.s32.totalorder %s4321_s7, %s4091_s21  ;;  %p4095_p4 = scmp.lt.u32.totalorder %s4091_s21, %s4321_s7 }
 0x3dd   :  { %p4097_p5 = pnand %p4095_p4, %p4092_p3 }
 0x3df   :  { %4100 = shalt.err (!%p4097_p5)
}
 0x3e0   :  { %s4122_s25 = smov 128   ;;  %s4123_s26 = smov 8  }
 0x3e1   :  { %3099 = dma.vmem_to_hbm [thread:$0]  %s3094_s18, 256, %s4321_s7, [#allocation5], %s4122_s25, %s4122_s25, %s4123_s26  }
 0x3e2   :  { %4107 = dma.done.wait [#allocation5], 256  }
 0x3e3   :  { %4108 = vsyncadd [#allocation5], 4294967040 }
 0x3e4   :  { %3103 = vsyncpa [#allocation4], 1 }
 0x3e5   :  { %3104 = vsyncpa [#allocation7], 1 }
 0x3e6   :  { %3105 = vsyncpa [#allocation10], 1 }
 0x3e7   :  { %3106 = vsyncpa [#allocation5], 1 }

</bundles_post_ra>
